<compile_context>
chip_gen: v5e
topology: v5e:2x2
jax: 0.10.0
libtpu: 0.0.40
codegen_flags: <defaults>
</compile_context>

<pallas_src>
import jax
import jax.numpy as jnp
import numpy as np
from jax.experimental import pallas as pl
from jax.experimental.pallas import tpu as pltpu

EPS = 1e-3


def _fused_kernel(xa_ref, xb_ref, w_ref, gb_ref, o_ref):
    # Elementwise add (VPU, f32 -- v5e has no bf16 VALU, so keep VPU work f32).
    x = xa_ref[...] + xb_ref[...]                          # (Cin, P) f32
    w = w_ref[...]                                         # (Cout, Cin) f32

    # 1x1 conv == channel matmul on the MXU: (Cout, Cin) @ (Cin, P).
    y = jnp.dot(w, x, preferred_element_type=jnp.float32)  # (Cout, P) f32

    p = y.shape[1]
    inv_p = 1.0 / p

    # Per-channel mean via the input side: mean(y) = W @ mean(x) exactly for a
    # 1x1 conv.  Cross-lane reduce is over (Cin, P) instead of (Cout, P) and
    # the matvec rides on the otherwise idle MXU.
    mean_x = jnp.sum(x, axis=1, keepdims=True) * inv_p                 # (Cin, 1)
    mean = jnp.dot(w, mean_x, preferred_element_type=jnp.float32)      # (Cout, 1)

    # Centered (two-pass) variance: avoids E[y^2] - E[y]^2 cancellation.
    yc = y - mean                                                      # (Cout, P)
    var = jnp.sum(yc * yc, axis=1, keepdims=True) * inv_p              # (Cout, 1)
    inv_std = jax.lax.rsqrt(var + EPS)                                 # (Cout, 1)

    # Fused affine params: column 0 = gamma, column 1 = beta.
    gamma = gb_ref[:, 0:1]                                             # (Cout, 1)
    beta = gb_ref[:, 1:2]                                              # (Cout, 1)
    scale = gamma * inv_std
    o_ref[...] = yc * scale + beta
    # TODO(synk): running_mean / running_var momentum update not emitted.


def fused_add_conv1x1_bn(x86, x78, w_oihw, gamma, beta):
    """x86, x78: (N, Cin, H, W) f32.  w_oihw: (Cout, Cin, 1, 1).  Returns NCHW."""
    n, cin, h, wdim = x86.shape
    cout = w_oihw.shape[0]
    p = n * h * wdim

    # NCHW -> (Cin, P).  For N == 1 this is a pure reshape (no data movement).
    def to_cp(x):
        if n == 1:
            return x.reshape(cin, p)
        # Fallback for N > 1 (not hit by this module's shapes).
        return jnp.transpose(x, (1, 0, 2, 3)).reshape(cin, p)

    xa = to_cp(x86)
    xb = to_cp(x78)
    w = w_oihw.reshape(cout, cin)            # (Cout, Cin) -- no transpose needed
    gb = jnp.stack([gamma, beta], axis=1)    # (Cout, 2): one merged param DMA

    vmem = pltpu.MemorySpace.VMEM
    cost = pl.CostEstimate(
        flops=2 * p * cin * cout + 2 * cin * cout + 7 * p * cout,
        transcendentals=cout,
        bytes_accessed=4 * (2 * p * cin + cin * cout + 2 * cout + p * cout),
    )

    out_cp = pl.pallas_call(
        _fused_kernel,
        out_shape=jax.ShapeDtypeStruct((cout, p), jnp.float32),
        in_specs=[
            pl.BlockSpec((cin, p), lambda: (0, 0), memory_space=vmem),
            pl.BlockSpec((cin, p), lambda: (0, 0), memory_space=vmem),
            pl.BlockSpec((cout, cin), lambda: (0, 0), memory_space=vmem),
            pl.BlockSpec((cout, 2), lambda: (0, 0), memory_space=vmem),
        ],
        out_specs=pl.BlockSpec((cout, p), lambda: (0, 0), memory_space=vmem),
        cost_estimate=cost,
        compiler_params=pltpu.CompilerParams(
            # Allow XLA to fuse the producers of the two activation inputs
            # (e.g. the NCHW reshape / upstream elementwise ops) into the
            # pallas-call input DMAs instead of round-tripping them via HBM.
            allow_input_fusion=[True, True, False, False],
        ),
    )(xa, xb, w, gb)

    # (Cout, P) -> NCHW.  For N == 1 this is a pure reshape.
    if n == 1:
        return out_cp.reshape(n, cout, h, wdim)
    return jnp.transpose(out_cp.reshape(cout, n, h, wdim), (1, 0, 2, 3))


def _reference(x86, x78, w_oihw, gamma, beta):
    """Pure-JAX reference for correctness checking."""
    x = x86 + x78
    y = jnp.einsum('nchw,oc->nohw', x, w_oihw.reshape(w_oihw.shape[0], -1))
    mean = jnp.mean(y, axis=(0, 2, 3))
    var = jnp.var(y, axis=(0, 2, 3))
    yn = (y - mean[None, :, None, None]) * jax.lax.rsqrt(var + EPS)[None, :, None, None]
    return yn * gamma[None, :, None, None] + beta[None, :, None, None]


if __name__ == "__main__":
    key = jax.random.PRNGKey(0)
    k1, k2, k3, k4, k5 = jax.random.split(key, 5)

    N, CIN, H, W_SP, COUT = 1, 80, 14, 14, 184

    x86 = jax.random.normal(k1, (N, CIN, H, W_SP), dtype=jnp.float32)
    x78 = jax.random.normal(k2, (N, CIN, H, W_SP), dtype=jnp.float32)

    # Deterministic parameter init (synthetic; shapes match Conv2d(80,184,1) + BN(184))
    w = jax.random.normal(k3, (COUT, CIN, 1, 1), dtype=jnp.float32) * (1.0 / np.sqrt(CIN))
    gamma = 1.0 + 0.1 * jax.random.normal(k4, (COUT,), dtype=jnp.float32)
    beta = 0.1 * jax.random.normal(k5, (COUT,), dtype=jnp.float32)

    out = jax.block_until_ready(fused_add_conv1x1_bn(x86, x78, w, gamma, beta))
    ref = jax.block_until_ready(_reference(x86, x78, w, gamma, beta))

    np.testing.assert_allclose(np.asarray(out), np.asarray(ref), rtol=2e-4, atol=2e-4)
    assert out.shape == (N, COUT, H, W_SP)
    print("KERNEL_OK")
</pallas_src>

<mosaic_0001>
module attributes {stable_mosaic.version = 11 : i64} {
  func.func @_fused_kernel(%arg0: memref<80x196xf32, #tpu.memory_space<vmem>>, %arg1: memref<80x196xf32, #tpu.memory_space<vmem>>, %arg2: memref<184x80xf32, #tpu.memory_space<vmem>>, %arg3: memref<184x2xf32, #tpu.memory_space<vmem>>, %arg4: memref<184x196xf32, #tpu.memory_space<vmem>>) attributes {dimension_semantics = [], scalar_prefetch = 0 : i64, scratch_operands = 0 : i64, tpu.core_type = #tpu.core_type<tc>} {
    %c0 = arith.constant 0 : index
    %c0_0 = arith.constant 0 : index
    %0 = vector.load %arg0[%c0, %c0_0] : memref<80x196xf32, #tpu.memory_space<vmem>>, vector<80x196xf32>
    %c0_1 = arith.constant 0 : index
    %c0_2 = arith.constant 0 : index
    %1 = vector.load %arg1[%c0_1, %c0_2] : memref<80x196xf32, #tpu.memory_space<vmem>>, vector<80x196xf32>
    %2 = arith.addf %0, %1 : vector<80x196xf32>
    %c0_3 = arith.constant 0 : index
    %c0_4 = arith.constant 0 : index
    %3 = vector.load %arg2[%c0_3, %c0_4] : memref<184x80xf32, #tpu.memory_space<vmem>>, vector<184x80xf32>
    %cst = arith.constant dense<0.000000e+00> : vector<184x196xf32>
    %4 = tpu.matmul %3, %2, %cst {dimension_numbers = #tpu.dot_dimension_numbers<[1], [0], [0], [1], [0, 0, 1, 1], [], []>} : vector<184x80xf32>, vector<80x196xf32>, vector<184x196xf32> -> vector<184x196xf32>
    %cst_5 = arith.constant dense<0.000000e+00> : vector<80xf32>
    %5 = vector.multi_reduction <add>, %2, %cst_5 [1] : vector<80x196xf32> to vector<80xf32>
    %6 = vector.shape_cast %5 : vector<80xf32> to vector<80x1xf32>
    %cst_6 = arith.constant 0.00510204071 : f32
    %7 = vector.broadcast %cst_6 : f32 to vector<80x1xf32>
    %8 = arith.mulf %6, %7 : vector<80x1xf32>
    %cst_7 = arith.constant dense<0.000000e+00> : vector<184x1xf32>
    %9 = tpu.matmul %3, %8, %cst_7 {dimension_numbers = #tpu.dot_dimension_numbers<[1], [0], [0], [1], [0, 0, 1, 1], [], []>} : vector<184x80xf32>, vector<80x1xf32>, vector<184x1xf32> -> vector<184x1xf32>
    %10 = vector.broadcast %9 : vector<184x1xf32> to vector<184x196xf32>
    %11 = arith.subf %4, %10 : vector<184x196xf32>
    %12 = arith.mulf %11, %11 : vector<184x196xf32>
    %cst_8 = arith.constant dense<0.000000e+00> : vector<184xf32>
    %13 = vector.multi_reduction <add>, %12, %cst_8 [1] : vector<184x196xf32> to vector<184xf32>
    %14 = vector.shape_cast %13 : vector<184xf32> to vector<184x1xf32>
    %cst_9 = arith.constant 0.00510204071 : f32
    %15 = vector.broadcast %cst_9 : f32 to vector<184x1xf32>
    %16 = arith.mulf %14, %15 : vector<184x1xf32>
    %cst_10 = arith.constant 1.000000e-03 : f32
    %17 = vector.broadcast %cst_10 : f32 to vector<184x1xf32>
    %18 = arith.addf %16, %17 : vector<184x1xf32>
    %19 = math.rsqrt %18 : vector<184x1xf32>
    %c0_11 = arith.constant 0 : index
    %c0_12 = arith.constant 0 : index
    %20 = vector.load %arg3[%c0_11, %c0_12] : memref<184x2xf32, #tpu.memory_space<vmem>>, vector<184x1xf32>
    %c0_13 = arith.constant 0 : index
    %c1 = arith.constant 1 : index
    %21 = vector.load %arg3[%c0_13, %c1] : memref<184x2xf32, #tpu.memory_space<vmem>>, vector<184x1xf32>
    %22 = arith.mulf %20, %19 : vector<184x1xf32>
    %23 = vector.broadcast %22 : vector<184x1xf32> to vector<184x196xf32>
    %24 = arith.mulf %11, %23 : vector<184x196xf32>
    %25 = vector.broadcast %21 : vector<184x1xf32> to vector<184x196xf32>
    %26 = arith.addf %24, %25 : vector<184x196xf32>
    %c0_14 = arith.constant 0 : index
    %c0_15 = arith.constant 0 : index
    %27 = vector.load %arg4[%c0_14, %c0_15] : memref<184x196xf32, #tpu.memory_space<vmem>>, vector<184x196xf32>
    tpu.vector_store %arg4[%c0_14, %c0_15], %26 {strides = array<i32>} : memref<184x196xf32, #tpu.memory_space<vmem>>, vector<184x196xf32>,
    return
  }
}

</mosaic_0001>

<bundles_post_ra>
// kernel: tpu_custom_call.1
= control target key start
LH: loop header
LB: loop body
LE: loop exit
PB: predicated region body
PF: predicated region fallthrough
CT: control target
= control target key end

     0   :  { %vm343_vm0 = vcmask 556032   ;;  %s2802_s0 = inlined_call_operand.vmem [shape: f32[80,196], index: 0, kind: input, shape index: {}]   ;;  %s2803_s1 = inlined_call_operand.vmem [shape: f32[80,196], index: 1, kind: input, shape index: {}]   ;;  %s2804_s2 = inlined_call_operand.vmem [shape: f32[184,80], index: 2, kind: input, shape index: {}]   ;;  %s2805_s3 = inlined_call_operand.vmem [shape: f32[184,2], index: 3, kind: input, shape index: {}]   ;;  %s2806_s4 = inlined_call_operand.hbm [shape: f32[184,196], index: 4, kind: output, shape index: {}]  }
   0x1   :  { %v18_v0 = vld [vmem:[%s2802_s0] sm:$0xff]  ;;  %v19_v1 = vld [vmem:[%s2802_s0 + $0x8] sm:$0xff]  ;;  %v21_v5 = vld [vmem:[%s2802_s0 + $0x18] sm:$0xff] }
   0x2   :  { %v38_v2 = vld [vmem:[%s2803_s1] sm:$0xff]  ;;  %v39_v3 = vld [vmem:[%s2803_s1 + $0x8] sm:$0xff]  ;;  %v20_v7 = vld [vmem:[%s2802_s0 + $0x10] sm:$0xff] }
   0x3   :  { %v1728_v4 = vadd.f32 %v38_v2, %v18_v0  ;;  %v1733_v6 = vadd.f32 %v39_v3, %v19_v1  ;;  %v40_v8 = vld [vmem:[%s2803_s1 + $0x10] sm:$0xff]  ;;  %v41_v9 = vld [vmem:[%s2803_s1 + $0x18] sm:$0xff]  ;;  %v26_v10 = vld [vmem:[%s2802_s0 + $0x40] sm:$0xff] }
   0x4   :  { %v27_v11 = vld [vmem:[%s2802_s0 + $0x48] sm:$0xff]  ;;  %v46_v12 = vld [vmem:[%s2803_s1 + $0x40] sm:$0xff]  ;;  %v1758_v15 = vadd.f32 %v41_v9, %v21_v5  ;;  %v28_v26 = vld [vmem:[%s2802_s0 + $0x50] sm:$0xff]  ;;  %v1786_v27 = vadd.f32 %v40_v8, %v20_v7 }
   0x5   :  { %v47_v13 = vld [vmem:[%s2803_s1 + $0x48] sm:$0xff]  ;;  %v344_v14 = vsel %vm343_vm0, %v1733_v6, 0.0  ;;  %v1760_v16 = vadd.f32 %v46_v12, %v26_v10  ;;  %v22_v18 = vld [vmem:[%s2802_s0 + $0x20] sm:$0xff]  ;;  %v29_v31 = vld [vmem:[%s2802_s0 + $0x58] sm:$0xff] }
   0x6   :  { %v1762_v17 = vadd.f32 %v47_v13, %v27_v11  ;;  %v23_v19 = vld [vmem:[%s2802_s0 + $0x28] sm:$0xff]  ;;  %v42_v20 = vld [vmem:[%s2803_s1 + $0x20] sm:$0xff]  ;;  %v345_v21 = vadd.f32 %v344_v14, %v1728_v4  ;;  %v48_v32 = vld [vmem:[%s2803_s1 + $0x50] sm:$0xff]  ;;  %v348_v34 = vsel %vm343_vm0, %v1758_v15, 0.0 }
   0x7   :  { %v43_v22 = vld [vmem:[%s2803_s1 + $0x28] sm:$0xff]  ;;  %v1777_v23 = vadd.f32 %v42_v20, %v22_v18  ;;  %v49_v33 = vld [vmem:[%s2803_s1 + $0x58] sm:$0xff]  ;;  %v24_v37 = vld [vmem:[%s2802_s0 + $0x30] sm:$0xff]  ;;  %v68_v41 = vadd.f32 %v48_v32, %v28_v26  ;;  %v349_v51 = vadd.f32 %v348_v34, %v1786_v27 }
   0x8   :  { %v360_v24 = vsel %vm343_vm0, %v1762_v17, 0.0  ;;  %v1781_v25 = vadd.f32 %v43_v22, %v23_v19  ;;  %346 = vadd.xlane.f32.xlu0 %v345_v21  ;;  %v31_v29 = vld [vmem:[%s2802_s0 + $0x68] sm:$0xff]  ;;  %v1808_v36 = vadd.f32 %v49_v33, %v29_v31  ;;  %v25_v38 = vld [vmem:[%s2802_s0 + $0x38] sm:$0xff]  ;;  %v44_v39 = vld [vmem:[%s2803_s1 + $0x30] sm:$0xff] }
   0x9   :  { %v361_v28 = vadd.f32 %v360_v24, %v1760_v16  ;;  %v51_v30 = vld [vmem:[%s2803_s1 + $0x68] sm:$0xff]  ;;  %v45_v42 = vld [vmem:[%s2803_s1 + $0x38] sm:$0xff]  ;;  %v36_v43 = vld [vmem:[%s2802_s0 + $0x90] sm:$0xff]  ;;  %v64_v52 = vadd.f32 %v44_v39, %v24_v37 }
   0xa   :  { %v352_v35 = vsel %vm343_vm0, %v1781_v25, 0.0  ;;  %v37_v44 = vld [vmem:[%s2802_s0 + $0x98] sm:$0xff]  ;;  %v30_v45 = vld [vmem:[%s2802_s0 + $0x60] sm:$0xff]  ;;  %v364_v46 = vsel %vm343_vm0, %v1808_v36, 0.0  ;;  %v1834_v47 = vadd.f32 %v45_v42, %v25_v38  ;;  %v56_v48 = vld [vmem:[%s2803_s1 + $0x90] sm:$0xff]  ;;  %v1858_v58 = vadd.f32 %v51_v30, %v31_v29 }
   0xb   :  { %362 = vadd.xlane.f32.xlu2 %v361_v28  ;;  %v353_v40 = vadd.f32 %v352_v35, %v1777_v23  ;;  %v57_v49 = vld [vmem:[%s2803_s1 + $0x98] sm:$0xff]  ;;  %v34_v50 = vld [vmem:[%s2802_s0 + $0x80] sm:$0xff]  ;;  %v76_v53 = vadd.f32 %v56_v48, %v36_v43  ;;  %v35_v54 = vld [vmem:[%s2802_s0 + $0x88] sm:$0xff]  ;;  %v365_v63 = vadd.f32 %v364_v46, %v68_v41 }
   0xc   :  { %v54_v55 = vld [vmem:[%s2803_s1 + $0x80] sm:$0xff]  ;;  %v55_v56 = vld [vmem:[%s2803_s1 + $0x88] sm:$0xff]  ;;  %v356_v59 = vsel %vm343_vm0, %v1834_v47, 0.0  ;;  %v77_v60 = vadd.f32 %v57_v49, %v37_v44  ;;  %v32_v61 = vld [vmem:[%s2802_s0 + $0x70] sm:$0xff] }
   0xd   :  { %354 = vadd.xlane.f32.xlu1 %v353_v40  ;;  %v50_v57 = vld [vmem:[%s2803_s1 + $0x60] sm:$0xff]  ;;  %v52_v62 = vld [vmem:[%s2803_s1 + $0x70] sm:$0xff]  ;;  %v74_v0 = vadd.f32 %v54_v55, %v34_v50  ;;  %v33_v1 = vld [vmem:[%s2802_s0 + $0x78] sm:$0xff]  ;;  %1556 = vmatpush.msra.mxu3 %v76_v53  ;;  %v75_v3 = vadd.f32 %v55_v56, %v35_v54 }
   0xe   :  { %v53_v2 = vld [vmem:[%s2803_s1 + $0x78] sm:$0xff]  ;;  %177 = vmatpush.msra.mxu0 %v76_v53  ;;  %263 = vmatpush.msra.mxu1 %v77_v60 }
   0xf   :  { %9 = vsyncpa [#allocation3], 0  ;;  %v70_v5 = vadd.f32 %v50_v57, %v30_v45  ;;  %v357_v7 = vadd.f32 %v356_v59, %v64_v52  ;;  %v72_v8 = vadd.f32 %v52_v62, %v32_v61  ;;  %1557 = vmatpush.msra.mxu3 %v74_v0  ;;  %v368_v9 = vsel %vm343_vm0, %v1858_v58, 0.0  ;;  %v1904_v21 = vld [vmem:[%s2804_s2 + $0x98] sm:$0xff]  ;;  %v1932_v22 = vld [vmem:[%s2804_s2 + $0xb0] sm:$0xff]  ;;  %s1475_s24 = sshll.u32 %s2806_s4, 4  ;;  %s1476_s24 = int_to_ptr.hbm [resolvable:$true] %s1475_s24 }
  0x10   :  { %350 = vadd.xlane.f32.xlu0 %v349_v51  ;;  %v73_v10 = vadd.f32 %v53_v2, %v33_v1  ;;  %178 = vmatpush.msra.mxu0 %v74_v0  ;;  %v376_v11 = vsel %vm343_vm0, %v75_v3, 0.0  ;;  %v380_v19 = vsel %vm343_vm0, %v77_v60, 0.0  ;;  %vm101_vm1 = vcmask 654336   ;;  %v78_v26 = vld [vmem:[%s2804_s2] sm:$0xff]  ;;  %v79_v29 = vld [vmem:[%s2804_s2 + $0x8] sm:$0xff]  ;;  %v1996_v48 = vld [vmem:[%s2805_s3 + $0x10] sm:$0xff] }
  0x11   :  { %264 = vmatpush.msra.mxu1 %v75_v3  ;;  %1558 = vmatpush.msra.mxu3 %v72_v8  ;;  %v369_v12 = vadd.f32 %v368_v9, %v70_v5  ;;  %v377_v14 = vadd.f32 %v376_v11, %v74_v0  ;;  %v381_v20 = vadd.f32 %v380_v19, %v76_v53  ;;  %v82_v45 = vld [vmem:[%s2804_s2 + $0x20] sm:$0xff]  ;;  %v83_v46 = vld [vmem:[%s2804_s2 + $0x28] sm:$0xff]  ;;  %v2807_v49 = vmov 1   ;;  %v85_v50 = vld [vmem:[%s2804_s2 + $0x38] sm:$0xff]  ;;  %s1689_s25 = smov 256   ;;  %s1690_s26 = smov 16  }
  0x12   :  { %179 = vmatpush.msra.mxu0 %v72_v8  ;;  %v372_v13 = vsel %vm343_vm0, %v73_v10, 0.0  ;;  %1593 = vset.pattern.permute.xlu1 %v2807_v49  ;;  %v86_v53 = vld [vmem:[%s2804_s2 + $0x40] sm:$0xff]  ;;  %v1062_v54 = vld [vmem:[%s2805_s3 + $0x38] sm:$0xff]  ;;  %v87_v56 = vld [vmem:[%s2804_s2 + $0x48] sm:$0xff] }
  0x13   :  { %366 = vadd.xlane.f32.xlu2 %v365_v63  ;;  %265 = vmatpush.msra.mxu1 %v73_v10  ;;  %v373_v18 = vadd.f32 %v372_v13, %v72_v8  ;;  %v2038_v57 = vld [vmem:[%s2805_s3 + $0x8] sm:$0xff]  ;;  %v2046_v59 = vld [vmem:[%s2805_s3] sm:$0xff]  ;;  %v1058_v62 = vld [vmem:[%s2805_s3 + $0x18] sm:$0xff] }
  0x14   :  { %1559 = vmatpush.msra.mxu3 %v70_v5  ;;  %180 = vmatpush.msra.mxu0 %v70_v5  ;;  %v1068_v63 = vld [vmem:[%s2805_s3 + $0x68] sm:$0xff]  ;;  %v89_v1 = vld [vmem:[%s2804_s2 + $0x58] sm:$0xff]  ;;  %v1071_v5 = vld [vmem:[%s2805_s3 + $0x80] sm:$0xff] }
  0x15   :  { %358 = vadd.xlane.f32.xlu1 %v357_v7  ;;  %266 = vmatpush.msra.mxu1 %v1858_v58  ;;  %v1060_v0 = vld [vmem:[%s2805_s3 + $0x28] sm:$0xff]  ;;  %v1063_v7 = vld [vmem:[%s2805_s3 + $0x40] sm:$0xff]  ;;  %v2098_v11 = vld [vmem:[%s2805_s3 + $0x98] sm:$0xff] }
  0x16   :  { %1560 = vmatpush.msra.mxu3 %v68_v41  ;;  %181 = vmatpush.msra.mxu0 %v68_v41  ;;  %v81_v41 = vld [vmem:[%s2804_s2 + $0x18] sm:$0xff]  ;;  %v90_v8 = vld [vmem:[%s2804_s2 + $0x60] sm:$0xff]  ;;  %v91_v13 = vld [vmem:[%s2804_s2 + $0x68] sm:$0xff] }
  0x17   :  { %267 = vmatpush.msra.mxu1 %v1808_v36  ;;  %1592 = vset.pattern.permute.xlu2 %v2807_v49 }
  0x18   :  { %370 = vadd.xlane.f32.xlu0 %v369_v12  ;;  %1561 = vmatpush.msra.mxu3 %v1760_v16  ;;  %v1066_v12 = vld [vmem:[%s2805_s3 + $0x58] sm:$0xff] }
  0x19   :  { %182 = vmatpush.msra.mxu0 %v1760_v16  ;;  %268 = vmatpush.msra.mxu1 %v1762_v17  ;;  %v1892_v16 = vld [vmem:[%s2804_s2 + $0x90] sm:$0xff] }
  0x1a   :  { %1562 = vmatpush.msra.mxu3 %v64_v52  ;;  %1591 = vset.pattern.permute.xlu0 %v2807_v49 }
  0x1b   :  { %378 = vadd.xlane.f32.xlu2 %v377_v14  ;;  %183 = vmatpush.msra.mxu0 %v64_v52  ;;  %v2015_v52 = vld [vmem:[%s2805_s3 + $0x20] sm:$0xff] }
  0x1c   :  { %269 = vmatpush.msra.mxu1 %v1834_v47  ;;  %1563 = vmatpush.msra.mxu3 %v1777_v23  ;;  %v1067_v14 = vld [vmem:[%s2805_s3 + $0x60] sm:$0xff] }
  0x1d   :  { %374 = vadd.xlane.f32.xlu1 %v373_v18  ;;  %184 = vmatpush.msra.mxu0 %v1777_v23  ;;  %v1069_v18 = vld [vmem:[%s2805_s3 + $0x70] sm:$0xff] }
  0x1e   :  { %270 = vmatpush.msra.mxu1 %v1781_v25  ;;  %1564 = vmatpush.msra.mxu3 %v1786_v27 }
  0x1f   :  { %185 = vmatpush.msra.mxu0 %v1786_v27 }
  0x20   :  { %271 = vmatpush.msra.mxu1 %v1758_v15  ;;  %382 = vadd.xlane.f32.xlu0 %v381_v20  ;;  %v92_v20 = vld [vmem:[%s2804_s2 + $0x70] sm:$0xff] }
  0x21   :  { %1565 = vmatpush.msra.mxu3 %v1728_v4  ;;  %186 = vmatpush.msra.mxu0 %v1728_v4  ;;  %v1914_v4 = vld [vmem:[%s2804_s2 + $0xa0] sm:$0xff] }
  0x22   :  { %1505 = vmatmul.msk.f32.vlgmr.msra.gmra.mxu3 %vm101_vm1, %v1892_v16  ;;  %272 = vmatpush.msra.mxu1 %v1733_v6 }
  0x23   :  { %1566 = vmatpush.msrb.mxu3 %v77_v60  ;;  %1487 = vmatmul.msk.f32.vlgmr.msra.gmra.mxu0 %vm101_vm1, %v78_v26  ;;  %v88_v60 = vld [vmem:[%s2804_s2 + $0x50] sm:$0xff] }
  0x24   :  { %1510 = vmatmul.msk.f32.vlgmr.msra.gmra.mxu1 %vm101_vm1, %v78_v26 }
  0x25   :  { %1567 = vmatpush.msrb.mxu3 %v75_v3  ;;  %v1061_v3 = vld [vmem:[%s2805_s3 + $0x30] sm:$0xff] }
  0x27   :  { %1568 = vmatpush.msrb.mxu3 %v73_v10  ;;  %v1064_v10 = vld [vmem:[%s2805_s3 + $0x48] sm:$0xff] }
  0x29   :  { %1569 = vmatpush.msrb.mxu3 %v1858_v58  ;;  %v1065_v58 = vld [vmem:[%s2805_s3 + $0x50] sm:$0xff] }
  0x2a   :  { %1506 = vmatmul.msk.f32.gmra.mxu3 %vm101_vm1, %v1904_v21 }
  0x2b   :  { %1570 = vmatpush.msrb.mxu3 %v1808_v36  ;;  %1488 = vmatmul.msk.f32.gmra.mxu0 %vm101_vm1, %v79_v29  ;;  %v80_v36 = vld [vmem:[%s2804_s2 + $0x10] sm:$0xff] }
  0x2c   :  { %1511 = vmatmul.msk.f32.gmra.mxu1 %vm101_vm1, %v79_v29 }
  0x2d   :  { %1571 = vmatpush.msrb.mxu3 %v1762_v17  ;;  %v1925_v17 = vld [vmem:[%s2804_s2 + $0xa8] sm:$0xff] }
  0x2f   :  { %1572 = vmatpush.msrb.mxu3 %v1834_v47  ;;  %v84_v47 = vld [vmem:[%s2804_s2 + $0x30] sm:$0xff] }
  0x31   :  { %1573 = vmatpush.msrb.mxu3 %v1781_v25 }
  0x32   :  { %1507 = vmatmul.msk.f32.gmra.mxu3 %vm101_vm1, %v1914_v4 }
  0x33   :  { %1574 = vmatpush.msrb.mxu3 %v1758_v15  ;;  %1489 = vmatmul.msk.f32.gmra.mxu0 %vm101_vm1, %v80_v36 }
  0x34   :  { %1512 = vmatmul.msk.f32.gmra.mxu1 %vm101_vm1, %v80_v36  ;;  %1269 = vperm.xlu2 %1592, %v2038_v57  }
  0x35   :  { %1575 = vmatpush.msrb.mxu3 %v1733_v6  ;;  %1264 = vperm.xlu0 %1591, %v2046_v59  }
  0x36   :  { %1274 = vperm.xlu1 %1593, %v1996_v48  }
  0x3a   :  { %1508 = vmatmul.msk.f32.gmra.mxu3 %vm101_vm1, %v1925_v17 }
  0x3b   :  { %1490 = vmatmul.msk.f32.gmra.mxu0 %vm101_vm1, %v81_v41 }
  0x3c   :  { %1513 = vmatmul.msk.f32.gmra.mxu1 %vm101_vm1, %v81_v41  ;;  %1279 = vperm.xlu2 %1592, %v1058_v62  }
  0x3d   :  { %1289 = vperm.xlu0 %1591, %v1060_v0  }
  0x3e   :  { %1284 = vperm.xlu1 %1593, %v2015_v52  }
  0x42   :  { %1509 = vmatmul.msk.f32.gmra.mxu3 %vm101_vm1, %v1932_v22 }
  0x43   :  { %1491 = vmatmul.msk.f32.gmra.mxu0 %vm101_vm1, %v82_v45 }
  0x44   :  { %1514 = vmatmul.msk.f32.gmra.mxu1 %vm101_vm1, %v82_v45  ;;  %1294 = vperm.xlu2 %1592, %v1061_v3  }
  0x45   :  { %1304 = vperm.xlu0 %1591, %v1063_v7  }
  0x46   :  { %1299 = vperm.xlu1 %1593, %v1062_v54  }
  0x4a   :  { %1528 = vmatmul.msk.f32.vlgmr.msrb.gmra.mxu3 %vm101_vm1, %v1892_v16 }
  0x4b   :  { %1492 = vmatmul.msk.f32.gmra.mxu0 %vm101_vm1, %v83_v46 }
  0x4c   :  { %1515 = vmatmul.msk.f32.gmra.mxu1 %vm101_vm1, %v83_v46  ;;  %1309 = vperm.xlu2 %1592, %v1064_v10  }
  0x4d   :  { %1319 = vperm.xlu0 %1591, %v1066_v12  }
  0x4e   :  { %1314 = vperm.xlu1 %1593, %v1065_v58  }
  0x52   :  { %1529 = vmatmul.msk.f32.gmra.mxu3 %vm101_vm1, %v1904_v21 }
  0x53   :  { %1493 = vmatmul.msk.f32.gmra.mxu0 %vm101_vm1, %v84_v47 }
  0x54   :  { %1516 = vmatmul.msk.f32.gmra.mxu1 %vm101_vm1, %v84_v47  ;;  %1324 = vperm.xlu2 %1592, %v1067_v14  }
  0x55   :  { %1334 = vperm.xlu0 %1591, %v1069_v18  }
  0x56   :  { %1329 = vperm.xlu1 %1593, %v1068_v63  }
  0x5a   :  { %1530 = vmatmul.msk.f32.gmra.mxu3 %vm101_vm1, %v1914_v4 }
  0x5b   :  { %1494 = vmatmul.msk.f32.gmra.mxu0 %vm101_vm1, %v85_v50 }
  0x5c   :  { %1517 = vmatmul.msk.f32.gmra.mxu1 %vm101_vm1, %v85_v50 }
  0x5e   :  { %1344 = vperm.xlu1 %1593, %v1071_v5  }
  0x62   :  { %1531 = vmatmul.msk.f32.gmra.mxu3 %vm101_vm1, %v1925_v17 }
  0x63   :  { %1495 = vmatmul.msk.f32.gmra.mxu0 %vm101_vm1, %v86_v53 }
  0x64   :  { %1518 = vmatmul.msk.f32.gmra.mxu1 %vm101_vm1, %v86_v53 }
  0x66   :  { %1359 = vperm.xlu1 %1593, %v2098_v11  }
  0x6a   :  { %1532 = vmatmul.msk.f32.gmra.mxu3 %vm101_vm1, %v1932_v22 }
  0x6b   :  { %1496 = vmatmul.msk.f32.gmra.mxu0 %vm101_vm1, %v87_v56 }
  0x6c   :  { %1519 = vmatmul.msk.f32.gmra.mxu1 %vm101_vm1, %v87_v56 }
  0x73   :  { %1497 = vmatmul.msk.f32.gmra.mxu0 %vm101_vm1, %v88_v60 }
  0x74   :  { %1520 = vmatmul.msk.f32.gmra.mxu1 %vm101_vm1, %v88_v60 }
  0x7b   :  { %v347_v6 = vpop.xlane.xlu0 %346  ;;  %1498 = vmatmul.msk.f32.gmra.mxu0 %vm101_vm1, %v89_v1 }
  0x7c   :  { %v384_v44 = vmul.f32 0.0051020407, %v347_v6  ;;  %1521 = vmatmul.msk.f32.gmra.mxu1 %vm101_vm1, %v89_v1  ;;  %v1687_v6 = vmov 0  }
  0x7d   :  { %1594 = vset.pattern.permute.xlu1 %v1687_v6 }
  0x7e   :  { %v363_v15 = vpop.xlane.xlu2 %362 }
  0x7f   :  { %v388_v39 = vmul.f32 0.0051020407, %v363_v15  ;;  %v94_v15 = vld [vmem:[%s2804_s2 + $0x80] sm:$0xff] }
  0x80   :  { %v355_v23 = vpop.xlane.xlu1 %354 }
  0x81   :  { %v386_v42 = vmul.f32 0.0051020407, %v355_v23 }
  0x83   :  { %v351_v24 = vpop.xlane.xlu0 %350  ;;  %1499 = vmatmul.msk.f32.gmra.mxu0 %vm101_vm1, %v90_v8 }
  0x84   :  { %v385_v43 = vmul.f32 0.0051020407, %v351_v24  ;;  %1522 = vmatmul.msk.f32.gmra.mxu1 %vm101_vm1, %v90_v8 }
  0x86   :  { %v367_v25 = vpop.xlane.xlu2 %366 }
  0x87   :  { %v389_v38 = vmul.f32 0.0051020407, %v367_v25 }
  0x88   :  { %v359_v27 = vpop.xlane.xlu1 %358 }
  0x89   :  { %v387_v40 = vmul.f32 0.0051020407, %v359_v27 }
  0x8b   :  { %v371_v28 = vpop.xlane.xlu0 %370  ;;  %1500 = vmatmul.msk.f32.gmra.mxu0 %vm101_vm1, %v91_v13 }
  0x8c   :  { %v390_v37 = vmul.f32 0.0051020407, %v371_v28  ;;  %1523 = vmatmul.msk.f32.gmra.mxu1 %vm101_vm1, %v91_v13 }
  0x8e   :  { %v379_v30 = vpop.xlane.xlu2 %378 }
  0x8f   :  { %v392_v34 = vmul.f32 0.0051020407, %v379_v30 }
  0x90   :  { %v375_v32 = vpop.xlane.xlu1 %374 }
  0x91   :  { %v391_v35 = vmul.f32 0.0051020407, %v375_v32 }
  0x93   :  { %v383_v31 = vpop.xlane.xlu0 %382  ;;  %1501 = vmatmul.msk.f32.gmra.mxu0 %vm101_vm1, %v92_v20 }
  0x94   :  { %v393_v33 = vmul.f32 0.0051020407, %v383_v31  ;;  %1524 = vmatmul.msk.f32.gmra.mxu1 %vm101_vm1, %v92_v20 }
  0x96   :  { %400 = vmatpush.msra.mxu2 %v393_v33  ;;  %1576 = vmatpush.msra.mxu3 %v393_v33 }
  0x98   :  { %401 = vmatpush.msra.mxu2 %v392_v34  ;;  %1577 = vmatpush.msra.mxu3 %v392_v34  ;;  %v95_v34 = vld [vmem:[%s2804_s2 + $0x88] sm:$0xff] }
  0x9a   :  { %402 = vmatpush.msra.mxu2 %v391_v35  ;;  %1578 = vmatpush.msra.mxu3 %v391_v35  ;;  %v2165_v35 = vpop.permute.xlu2 %1269 }
  0x9c   :  { %403 = vmatpush.msra.mxu2 %v390_v37  ;;  %1579 = vmatpush.msra.mxu3 %v390_v37 }
  0x9e   :  { %404 = vmatpush.msra.mxu2 %v389_v38  ;;  %1580 = vmatpush.msra.mxu3 %v389_v38 }
  0xa0   :  { %405 = vmatpush.msra.mxu2 %v388_v39  ;;  %1581 = vmatpush.msra.mxu3 %v388_v39 }
  0xa2   :  { %406 = vmatpush.msra.mxu2 %v387_v40  ;;  %1582 = vmatpush.msra.mxu3 %v387_v40  ;;  %v2167_v38 = vpop.permute.xlu2 %1279 }
  0xa3   :  { %2841 = vst [vmem:[#allocation5_spill] sm:$0xff] %v2167_v38 }
  0xa4   :  { %407 = vmatpush.msra.mxu2 %v386_v42  ;;  %1583 = vmatpush.msra.mxu3 %v386_v42 }
  0xa5   :  { %v2007_v51 = vpop.f32.mrf.mxu3 }
  0xa6   :  { %408 = vmatpush.msra.mxu2 %v385_v43  ;;  %1584 = vmatpush.msra.mxu3 %v385_v43  ;;  %v188_v43 = vpop.f32.mrf.mxu0 }
  0xa8   :  { %409 = vmatpush.msra.mxu2 %v384_v44  ;;  %1585 = vmatpush.msra.mxu3 %v384_v44  ;;  %v2177_v54 = vpop.permute.xlu1 %1274 }
  0xa9   :  { %1533 = vmatmul.msk.f32.vlgmr.msra.gmra.mxu2 %vm101_vm1, %v78_v26  ;;  %1551 = vmatmul.msk.f32.vlgmr.msra.gmra.mxu3 %vm101_vm1, %v1892_v16  ;;  %v1070_v16 = vld [vmem:[%s2805_s3 + $0x78] sm:$0xff] }
  0xaa   :  { %1339 = vperm.xlu2 %1592, %v1070_v16  }
  0xad   :  { %v2027_v55 = vpop.f32.mrf.mxu3 }
  0xb0   :  { %v2185_v63 = vpop.permute.xlu1 %1284 }
  0xb1   :  { %1534 = vmatmul.msk.f32.gmra.mxu2 %vm101_vm1, %v79_v29  ;;  %1552 = vmatmul.msk.f32.gmra.mxu3 %vm101_vm1, %v1904_v21  ;;  %v1072_v21 = vld [vmem:[%s2805_s3 + $0x88] sm:$0xff] }
  0xb2   :  { %1349 = vperm.xlu0 %1591, %v1072_v21  }
  0xb5   :  { %v2053_v61 = vpop.f32.mrf.mxu3 }
  0xb8   :  { %v2191_v10 = vpop.permute.xlu1 %1299 }
  0xb9   :  { %1535 = vmatmul.msk.f32.gmra.mxu2 %vm101_vm1, %v80_v36  ;;  %1553 = vmatmul.msk.f32.gmra.mxu3 %vm101_vm1, %v1914_v4  ;;  %v93_v4 = vld [vmem:[%s2804_s2 + $0x78] sm:$0xff] }
  0xba   :  { %1525 = vmatmul.msk.f32.gmra.mxu1 %vm101_vm1, %v93_v4  ;;  %1502 = vmatmul.msk.f32.gmra.mxu0 %vm101_vm1, %v93_v4 }
  0xbb   :  { %1595 = vset.pattern.permute.xlu0 %v1687_v6 }
  0xbd   :  { %v2072_v2 = vpop.f32.mrf.mxu3 }
  0xc0   :  { %v2199_v16 = vpop.permute.xlu1 %1314 }
  0xc1   :  { %1536 = vmatmul.msk.f32.gmra.mxu2 %vm101_vm1, %v81_v41  ;;  %1554 = vmatmul.msk.f32.gmra.mxu3 %vm101_vm1, %v1925_v17  ;;  %v2169_v41 = vpop.permute.xlu2 %1294  ;;  %2847 = vst [vmem:[#allocation11_spill] sm:$0xff] %v2199_v16 }
  0xc2   :  { %1526 = vmatmul.msk.f32.gmra.mxu1 %vm101_vm1, %v94_v15  ;;  %1503 = vmatmul.msk.f32.gmra.mxu0 %vm101_vm1, %v94_v15  ;;  %2842 = vst [vmem:[#allocation6_spill] sm:$0xff] %v2169_v41 }
  0xc5   :  { %v2089_v9 = vpop.f32.mrf.mxu3 }
  0xc9   :  { %1537 = vmatmul.msk.f32.gmra.mxu2 %vm101_vm1, %v82_v45  ;;  %1555 = vmatmul.msk.f32.gmra.mxu3 %vm101_vm1, %v1932_v22  ;;  %v2141_v22 = vld [vmem:[%s2805_s3 + $0x90] sm:$0xff]  ;;  %v2171_v44 = vpop.permute.xlu2 %1309  ;;  %v274_v45 = vpop.f32.mrf.mxu1 }
  0xca   :  { %1354 = vperm.xlu2 %1592, %v2141_v22   ;;  %1504 = vmatmul.msk.f32.gmra.mxu0 %vm101_vm1, %v95_v34  ;;  %2843 = vst [vmem:[#allocation7_spill] sm:$0xff] %v2171_v44 }
  0xcb   :  { %1527 = vmatmul.msk.f32.gmra.mxu1 %vm101_vm1, %v95_v34 }
  0xcd   :  { %v2116_v19 = vpop.f32.mrf.mxu3 }
  0xd1   :  { %1538 = vmatmul.msk.f32.gmra.mxu2 %vm101_vm1, %v83_v46 }
  0xd2   :  { %1596 = vset.pattern.permute.xlu2 %v1687_v6 }
  0xd5   :  { %v2133_v17 = vpop.f32.mrf.mxu3 }
  0xd9   :  { %1539 = vmatmul.msk.f32.gmra.mxu2 %vm101_vm1, %v84_v47  ;;  %v277_v47 = vpop.f32.mrf.mxu1 }
  0xdd   :  { %v2149_v23 = vpop.f32.mrf.mxu3 }
  0xe1   :  { %1540 = vmatmul.msk.f32.gmra.mxu2 %vm101_vm1, %v85_v50  ;;  %v2173_v50 = vpop.f32.mrf.mxu0  ;;  %v2179_v58 = vpop.f32.mrf.mxu1 }
  0xe5   :  { %v2152_v24 = vpop.f32.mrf.mxu3 }
  0xe9   :  { %1541 = vmatmul.msk.f32.gmra.mxu2 %vm101_vm1, %v86_v53  ;;  %v2175_v53 = vpop.permute.xlu2 %1324  ;;  %v283_v3 = vpop.f32.mrf.mxu1 }
  0xea   :  { %2844 = vst [vmem:[#allocation8_spill] sm:$0xff] %v2175_v53 }
  0xed   :  { %v2156_v25 = vpop.f32.mrf.mxu3 }
  0xf1   :  { %1542 = vmatmul.msk.f32.gmra.mxu2 %vm101_vm1, %v87_v56  ;;  %v2195_v14 = vpop.f32.mrf.mxu1 }
  0xf9   :  { %1543 = vmatmul.msk.f32.gmra.mxu2 %vm101_vm1, %v88_v60  ;;  %v2181_v60 = vpop.f32.mrf.mxu0  ;;  %v2203_v6 = vpop.f32.mrf.mxu1 }
 0x101   :  { %1544 = vmatmul.msk.f32.gmra.mxu2 %vm101_vm1, %v89_v1  ;;  %v2187_v1 = vpop.permute.xlu0 %1264  ;;  %v197_v5 = vpop.f32.mrf.mxu0 }
 0x104   :  { %v2183_v62 = vpop.permute.xlu2 %1339 }
 0x105   :  { %2845 = vst [vmem:[#allocation9_spill] sm:$0xff] %v2183_v62 }
 0x109   :  { %1545 = vmatmul.msk.f32.gmra.mxu2 %vm101_vm1, %v90_v8  ;;  %v2193_v12 = vpop.permute.xlu0 %1289  ;;  %v2197_v18 = vpop.f32.mrf.mxu0 }
 0x10a   :  { %2846 = vst [vmem:[#allocation10_spill] sm:$0xff] %v2193_v12 }
 0x111   :  { %1546 = vmatmul.msk.f32.gmra.mxu2 %vm101_vm1, %v91_v13 }
 0x119   :  { %1547 = vmatmul.msk.f32.gmra.mxu2 %vm101_vm1, %v92_v20 }
 0x121   :  { %1548 = vmatmul.msk.f32.gmra.mxu2 %vm101_vm1, %v93_v4  ;;  %v2201_v4 = vpop.permute.xlu0 %1304 }
 0x122   :  { %2848 = vst [vmem:[#allocation12_spill] sm:$0xff] %v2201_v4 }
 0x124   :  { %v2189_v8 = vpop.permute.xlu2 %1354 }
 0x129   :  { %1549 = vmatmul.msk.f32.gmra.mxu2 %vm101_vm1, %v94_v15 }
 0x12c   :  { %v411_v26 = vpop.f32.mrf.mxu2  ;;  %v465_v27 = vpop.f32.mrf.mxu3 }
 0x12d   :  { %482 = vperm.xlu1 %1594, %v411_v26   ;;  %572 = vperm.xlu0 %1595, %v465_v27   ;;  %v2205_v26 = vpop.f32.mrf.mxu0  ;;  %v2207_v27 = vpop.permute.xlu1 %1329 }
 0x12e   :  { %2849 = vst [vmem:[#allocation13_spill] sm:$0xff] %v2207_v27 }
 0x131   :  { %1550 = vmatmul.msk.f32.gmra.mxu2 %vm101_vm1, %v95_v34 }
 0x134   :  { %v414_v28 = vpop.f32.mrf.mxu2  ;;  %v468_v29 = vpop.f32.mrf.mxu3 }
 0x135   :  { %487 = vperm.xlu2 %1596, %v414_v28   ;;  %v206_v34 = vpop.f32.mrf.mxu0 }
 0x13c   :  { %v417_v30 = vpop.f32.mrf.mxu2  ;;  %v471_v31 = vpop.f32.mrf.mxu3 }
 0x13d   :  { %492 = vperm.xlu0 %1595, %v417_v30   ;;  %577 = vperm.xlu2 %1596, %v468_v29   ;;  %v2209_v29 = vpop.permute.xlu0 %1319 }
 0x13e   :  { %582 = vperm.xlu1 %1594, %v471_v31   ;;  %2850 = vst [vmem:[#allocation14_spill] sm:$0xff] %v2209_v29 }
 0x144   :  { %v420_v32 = vpop.f32.mrf.mxu2  ;;  %v474_v33 = vpop.f32.mrf.mxu3 }
 0x145   :  { %497 = vperm.xlu2 %1596, %v420_v32   ;;  %587 = vperm.xlu0 %1595, %v474_v33   ;;  %v292_v33 = vpop.f32.mrf.mxu1 }
 0x14c   :  { %v423_v36 = vpop.f32.mrf.mxu2  ;;  %v477_v37 = vpop.f32.mrf.mxu3 }
 0x14d   :  { %502 = vperm.xlu1 %1594, %v423_v36   ;;  %592 = vperm.xlu2 %1596, %v477_v37   ;;  %v2215_v36 = vpop.permute.xlu1 %1344 }
 0x14e   :  { %2852 = vst [vmem:[#allocation16_spill] sm:$0xff] %v2215_v36 }
 0x154   :  { %v426_v39 = vpop.f32.mrf.mxu2 }
 0x155   :  { %507 = vperm.xlu2 %1596, %v426_v39   ;;  %v2217_v39 = vpop.permute.xlu0 %1334 }
 0x156   :  { %2853 = vst [vmem:[#allocation17_spill] sm:$0xff] %v2217_v39 }
 0x15c   :  { %v429_v40 = vpop.f32.mrf.mxu2 }
 0x15d   :  { %512 = vperm.xlu1 %1594, %v429_v40   ;;  %v2219_v40 = vpop.f32.mrf.mxu1 }
 0x164   :  { %v432_v42 = vpop.f32.mrf.mxu2 }
 0x165   :  { %517 = vperm.xlu2 %1596, %v432_v42   ;;  %v2221_v42 = vpop.f32.mrf.mxu0 }
 0x16c   :  { %v435_v46 = vpop.f32.mrf.mxu2 }
 0x16d   :  { %522 = vperm.xlu1 %1594, %v435_v46  }
 0x174   :  { %v438_v56 = vpop.f32.mrf.mxu2 }
 0x175   :  { %527 = vperm.xlu0 %1595, %v438_v56   ;;  %v2223_v56 = vpop.permute.xlu1 %1359 }
 0x17c   :  { %v441_v0 = vpop.f32.mrf.mxu2 }
 0x17d   :  { %532 = vperm.xlu2 %1596, %v441_v0   ;;  %v2225_v0 = vpop.permute.xlu0 %1349 }
 0x17e   :  { %2854 = vst [vmem:[#allocation18_spill] sm:$0xff] %v2225_v0 }
 0x184   :  { %v444_v7 = vpop.f32.mrf.mxu2 }
 0x185   :  { %537 = vperm.xlu1 %1594, %v444_v7  }
 0x18c   :  { %v447_v13 = vpop.f32.mrf.mxu2 }
 0x18d   :  { %542 = vperm.xlu0 %1595, %v447_v13  }
 0x18f   :  { %v488_v20 = vpop.permute.xlu2 %487 }
 0x190   :  { %v2243_v39 = vsub.f32 %v277_v47, %v488_v20 }
 0x192   :  { %v644_v53 = vmul.f32 %v2243_v39, %v2243_v39 }
 0x194   :  { %v450_v21 = vpop.f32.mrf.mxu2 }
 0x195   :  { %547 = vperm.xlu2 %1596, %v450_v21  }
 0x197   :  { %v578_v15 = vpop.permute.xlu2 %577 }
 0x19c   :  { %v453_v28 = vpop.f32.mrf.mxu2 }
 0x19d   :  { %552 = vperm.xlu1 %1594, %v453_v28  }
 0x19f   :  { %v498_v30 = vpop.permute.xlu2 %497  ;;  %v483_v7 = vpop.permute.xlu1 %482 }
 0x1a0   :  { %v2211_v31 = vsub.f32 %v283_v3, %v498_v30  ;;  %v2213_v32 = vsub.f32 %v197_v5, %v498_v30  ;;  %v2227_v3 = vpop.f32.mrf.mxu1  ;;  %v2229_v5 = vpop.f32.mrf.mxu0  ;;  %v2231_v13 = vsub.f32 %v274_v45, %v483_v7  ;;  %v2233_v21 = vsub.f32 %v188_v43, %v483_v7 }
 0x1a1   :  { %v573_v30 = vpop.permute.xlu0 %572  ;;  %v2250_v45 = vsub.f32 %v2173_v50, %v488_v20  ;;  %v2264_v50 = vsub.f32 %v2133_v17, %v578_v15 }
 0x1a2   :  { %2851 = vst [vmem:[#allocation15_spill] sm:$0xff] %v2211_v31  ;;  %v642_v28 = vmul.f32 %v2231_v13, %v2231_v13  ;;  %v641_v0 = vmul.f32 %v2233_v21, %v2233_v21  ;;  %v2246_v29 = vsub.f32 %v2116_v19, %v573_v30  ;;  %v2253_v7 = vsub.f32 %v2007_v51, %v573_v30 }
 0x1a3   :  { %v643_v19 = vmul.f32 %v2250_v45, %v2250_v45  ;;  %v680_v17 = vmul.f32 %v2264_v50, %v2264_v50 }
 0x1a4   :  { %v456_v37 = vpop.f32.mrf.mxu2  ;;  %v687_v43 = vsel %vm343_vm0, %v642_v28, 0.0  ;;  %v678_v47 = vmul.f32 %v2246_v29, %v2246_v29  ;;  %v677_v51 = vmul.f32 %v2253_v7, %v2253_v7 }
 0x1a5   :  { %557 = vperm.xlu0 %1595, %v456_v37   ;;  %v688_v4 = vadd.f32 %v687_v43, %v641_v0  ;;  %v2278_v43 = vsub.f32 %v2027_v55, %v578_v15 }
 0x1a6   :  { %v759_v30 = vsel %vm343_vm0, %v678_v47, 0.0 }
 0x1a7   :  { %v2255_v62 = vpop.permute.xlu2 %592  ;;  %v760_v44 = vadd.f32 %v759_v30, %v677_v51  ;;  %v679_v15 = vmul.f32 %v2278_v43, %v2278_v43 }
 0x1a8   :  { %v2237_v49 = vpop.f32.mrf.mxu1 }
 0x1ac   :  { %v459_v46 = vpop.f32.mrf.mxu2 }
 0x1ad   :  { %562 = vperm.xlu2 %1596, %v459_v46   ;;  %v2239_v46 = vpop.f32.mrf.mxu0 }
 0x1af   :  { %v493_v41 = vpop.permute.xlu0 %492  ;;  %v508_v27 = vpop.permute.xlu2 %507 }
 0x1b0   :  { %v583_v37 = vpop.permute.xlu1 %582  ;;  %v2268_v20 = vpop.f32.mrf.mxu1  ;;  %v2311_v51 = vsub.f32 %v2205_v26, %v508_v27 }
 0x1b1   :  { %v2273_v28 = vsub.f32 %v2149_v23, %v583_v37  ;;  %v2283_v38 = vsub.f32 %v2053_v61, %v583_v37  ;;  %v2294_v61 = vsub.f32 %v2179_v58, %v493_v41  ;;  %v763_v37 = vsel %vm343_vm0, %v680_v17, 0.0 }
 0x1b2   :  { %2858 = vst [vmem:[#allocation22_spill] sm:$0xff] %v2311_v51 }
 0x1b3   :  { %2855 = vst [vmem:[#allocation19_spill] sm:$0xff] %v2273_v28  ;;  %v682_v23 = vmul.f32 %v2273_v28, %v2273_v28  ;;  %v681_v47 = vmul.f32 %v2283_v38, %v2283_v38  ;;  %v646_v58 = vmul.f32 %v2294_v61, %v2294_v61 }
 0x1b4   :  { %2856 = vst [vmem:[#allocation20_spill] sm:$0xff] %v2283_v38 }
 0x1b5   :  { %v2270_v0 = vpop.f32.mrf.mxu0  ;;  %v695_v17 = vsel %vm343_vm0, %v646_v58, 0.0 }
 0x1bf   :  { %v503_v12 = vpop.permute.xlu1 %502 }
 0x1c7   :  { %689 = vadd.xlane.f32.xlu1 %v688_v4  ;;  %v691_v4 = vsel %vm343_vm0, %v644_v53, 0.0 }
 0x1c8   :  { %v692_v36 = vadd.f32 %v691_v4, %v643_v19  ;;  %v2300_v19 = vsub.f32 %v2203_v6, %v508_v27  ;;  %v2325_v27 = vsub.f32 %v2197_v18, %v503_v12  ;;  %v2343_v18 = vsub.f32 %v2156_v25, %v2255_v62  ;;  %v462_v25 = vpop.f32.mrf.mxu2 }
 0x1ca   :  { %2857 = vst [vmem:[#allocation21_spill] sm:$0xff] %v2300_v19  ;;  %v652_v6 = vmul.f32 %v2300_v19, %v2300_v19 }
 0x1cb   :  { %2861 = vst [vmem:[#allocation25_spill] sm:$0xff] %v2343_v18 }
 0x1cc   :  { %v707_v26 = vsel %vm343_vm0, %v652_v6, 0.0 }
 0x1cf   :  { %v513_v16 = vpop.permute.xlu1 %512  ;;  %761 = vadd.xlane.f32.xlu1 %v760_v44  ;;  %693 = vadd.xlane.f32.xlu0 %v692_v36  ;;  %v767_v44 = vsel %vm343_vm0, %v682_v23, 0.0  ;;  %v764_v36 = vadd.f32 %v763_v37, %v679_v15 }
 0x1d0   :  { %v2287_v53 = vsub.f32 %v206_v34, %v513_v16  ;;  %v2289_v55 = vsub.f32 %v292_v33, %v513_v16  ;;  %v2303_v34 = vpop.f32.mrf.mxu1  ;;  %v221_v16 = vpop.f32.mrf.mxu0  ;;  %v2306_v33 = vsub.f32 %v2181_v60, %v493_v41  ;;  %v768_v30 = vadd.f32 %v767_v44, %v681_v47 }
 0x1d1   :  { %v651_v41 = vmul.f32 %v2311_v51, %v2311_v51  ;;  %v2320_v60 = vsub.f32 %v2195_v14, %v503_v12  ;;  %v649_v12 = vmul.f32 %v2325_v27, %v2325_v27 }
 0x1d2   :  { %v645_v4 = vmul.f32 %v2306_v33, %v2306_v33 }
 0x1d3   :  { %v650_v15 = vmul.f32 %v2320_v60, %v2320_v60  ;;  %v708_v37 = vadd.f32 %v707_v26, %v651_v41 }
 0x1d4   :  { %v696_v23 = vadd.f32 %v695_v17, %v645_v4  ;;  %v686_v17 = vmul.f32 %v2343_v18, %v2343_v18 }
 0x1d6   :  { %765 = vadd.xlane.f32.xlu2 %v764_v36 }
 0x1d7   :  { %769 = vadd.xlane.f32.xlu0 %v768_v30  ;;  %v703_v30 = vsel %vm343_vm0, %v650_v15, 0.0 }
 0x1d8   :  { %v2329_v47 = vpop.f32.mrf.mxu1  ;;  %v2331_v44 = vpop.f32.mrf.mxu0 }
 0x1de   :  { %697 = vadd.xlane.f32.xlu2 %v696_v23  ;;  %v518_v23 = vpop.permute.xlu2 %517 }
 0x1df   :  { %v523_v36 = vpop.permute.xlu1 %522  ;;  %709 = vadd.xlane.f32.xlu0 %v708_v37 }
 0x1e0   :  { %v2334_v14 = vsub.f32 %v2229_v5, %v523_v36  ;;  %v2337_v58 = vsub.f32 %v2227_v3, %v523_v36  ;;  %v2352_v5 = vsub.f32 %v2089_v9, %v2255_v62  ;;  %v704_v3 = vadd.f32 %v703_v30, %v649_v12  ;;  %v313_v15 = vpop.f32.mrf.mxu1  ;;  %v227_v37 = vpop.f32.mrf.mxu0 }
 0x1e1   :  { %v2360_v9 = vsub.f32 %v2219_v40, %v518_v23  ;;  %v775_v62 = vsel %vm343_vm0, %v686_v17, 0.0  ;;  %v2364_v12 = vsub.f32 %v2221_v42, %v518_v23 }
 0x1e2   :  { %2859 = vst [vmem:[#allocation23_spill] sm:$0xff] %v2334_v14  ;;  %v658_v6 = vmul.f32 %v2337_v58, %v2337_v58  ;;  %v657_v4 = vmul.f32 %v2334_v14, %v2334_v14  ;;  %v685_v36 = vmul.f32 %v2352_v5, %v2352_v5 }
 0x1e3   :  { %2860 = vst [vmem:[#allocation24_spill] sm:$0xff] %v2337_v58 }
 0x1e4   :  { %2862 = vst [vmem:[#allocation26_spill] sm:$0xff] %v2352_v5  ;;  %v719_v41 = vsel %vm343_vm0, %v658_v6, 0.0  ;;  %v776_v30 = vadd.f32 %v775_v62, %v685_v36  ;;  %v656_v6 = vmul.f32 %v2360_v9, %v2360_v9 }
 0x1e5   :  { %v720_v26 = vadd.f32 %v719_v41, %v657_v4 }
 0x1e6   :  { %705 = vadd.xlane.f32.xlu2 %v704_v3  ;;  %v533_v4 = vpop.permute.xlu2 %532  ;;  %v655_v3 = vmul.f32 %v2364_v12, %v2364_v12  ;;  %v715_v40 = vsel %vm343_vm0, %v656_v6, 0.0 }
 0x1e7   :  { %721 = vadd.xlane.f32.xlu0 %v720_v26  ;;  %v2371_v41 = vsub.f32 %v2268_v20, %v533_v4  ;;  %v2375_v17 = vsub.f32 %v2270_v0, %v533_v4 }
 0x1e8   :  { %567 = vperm.xlu1 %1594, %v462_v25   ;;  %v316_v25 = vpop.f32.mrf.mxu1  ;;  %v230_v26 = vpop.f32.mrf.mxu0  ;;  %v716_v42 = vadd.f32 %v715_v40, %v655_v3 }
 0x1e9   :  { %v662_v23 = vmul.f32 %v2371_v41, %v2371_v41 }
 0x1eb   :  { %v727_v0 = vsel %vm343_vm0, %v662_v23, 0.0 }
 0x1ee   :  { %777 = vadd.xlane.f32.xlu2 %v776_v30  ;;  %v661_v30 = vmul.f32 %v2375_v17, %v2375_v17 }
 0x1ef   :  { %v548_v36 = vpop.permute.xlu2 %547 }
 0x1f0   :  { %v2386_v6 = vsub.f32 %v313_v15, %v548_v36  ;;  %v2393_v40 = vpop.f32.mrf.mxu1  ;;  %v2397_v38 = vsub.f32 %v227_v37, %v548_v36 }
 0x1f2   :  { %v668_v15 = vmul.f32 %v2386_v6, %v2386_v6  ;;  %v667_v23 = vmul.f32 %v2397_v38, %v2397_v38 }
 0x1f6   :  { %717 = vadd.xlane.f32.xlu2 %v716_v42  ;;  %v2395_v42 = vpop.f32.mrf.mxu0 }
 0x1f7   :  { %v538_v62 = vpop.permute.xlu1 %537 }
 0x1f8   :  { %v2381_v28 = vsub.f32 %v221_v16, %v538_v62  ;;  %v2384_v20 = vsub.f32 %v2303_v34, %v538_v62  ;;  %v728_v16 = vadd.f32 %v727_v0, %v661_v30  ;;  %v322_v58 = vpop.f32.mrf.mxu1  ;;  %v648_v0 = vmul.f32 %v2211_v31, %v2211_v31 }
 0x1fa   :  { %2863 = vst [vmem:[#allocation27_spill] sm:$0xff] %v2381_v28  ;;  %v664_v4 = vmul.f32 %v2384_v20, %v2384_v20  ;;  %v663_v3 = vmul.f32 %v2381_v28, %v2381_v28 }
 0x1fb   :  { %2864 = vst [vmem:[#allocation28_spill] sm:$0xff] %v2384_v20  ;;  %v739_v20 = vsel %vm343_vm0, %v668_v15, 0.0 }
 0x1fc   :  { %v731_v34 = vsel %vm343_vm0, %v664_v4, 0.0  ;;  %v740_v28 = vadd.f32 %v739_v20, %v667_v23  ;;  %v588_v4 = vpop.permute.xlu0 %587  ;;  %v647_v20 = vmul.f32 %v2213_v32, %v2213_v32 }
 0x1fd   :  { %v732_v62 = vadd.f32 %v731_v34, %v663_v3  ;;  %v699_v34 = vsel %vm343_vm0, %v648_v0, 0.0 }
 0x1fe   :  { %729 = vadd.xlane.f32.xlu2 %v728_v16  ;;  %v236_v14 = vpop.f32.mrf.mxu0  ;;  %v700_v19 = vadd.f32 %v699_v34, %v647_v20 }
 0x1ff   :  { %733 = vadd.xlane.f32.xlu0 %v732_v62  ;;  %v2423_v62 = vsub.f32 %v2072_v2, %v588_v4 }
 0x201   :  { %2866 = vst [vmem:[#allocation30_spill] sm:$0xff] %v2423_v62  ;;  %v683_v2 = vmul.f32 %v2423_v62, %v2423_v62 }
 0x204   :  { %v528_v20 = vpop.permute.xlu0 %527 }
 0x205   :  { %v2448_v34 = vsub.f32 %v2239_v46, %v528_v20 }
 0x206   :  { %741 = vadd.xlane.f32.xlu2 %v740_v28 }
 0x207   :  { %v563_v37 = vpop.permute.xlu2 %562 }
 0x208   :  { %v2405_v36 = vsub.f32 %v322_v58, %v563_v37  ;;  %v2407_v30 = vsub.f32 %v236_v14, %v563_v37  ;;  %v2419_v58 = vsub.f32 %v2152_v24, %v588_v4 }
 0x20a   :  { %v674_v3 = vmul.f32 %v2405_v36, %v2405_v36  ;;  %v673_v16 = vmul.f32 %v2407_v30, %v2407_v30  ;;  %2865 = vst [vmem:[#allocation29_spill] sm:$0xff] %v2419_v58  ;;  %v684_v51 = vmul.f32 %v2419_v58, %v2419_v58 }
 0x20c   :  { %v751_v28 = vsel %vm343_vm0, %v674_v3, 0.0 }
 0x20d   :  { %v752_v14 = vadd.f32 %v751_v28, %v673_v16  ;;  %v654_v16 = vmul.f32 %v2289_v55, %v2289_v55  ;;  %v2444_v28 = vsub.f32 %v2237_v49, %v528_v20 }
 0x20f   :  { %v553_v15 = vpop.permute.xlu1 %552  ;;  %753 = vadd.xlane.f32.xlu2 %v752_v14  ;;  %v711_v14 = vsel %vm343_vm0, %v654_v16, 0.0 }
 0x210   :  { %v2425_v23 = vsub.f32 %v230_v26, %v553_v15  ;;  %v2427_v37 = vsub.f32 %v316_v25, %v553_v15  ;;  %v771_v25 = vsel %vm343_vm0, %v684_v51, 0.0  ;;  %v660_v51 = vmul.f32 %v2444_v28, %v2444_v28 }
 0x211   :  { %v772_v4 = vadd.f32 %v771_v25, %v683_v2 }
 0x212   :  { %2867 = vst [vmem:[#allocation31_spill] sm:$0xff] %v2425_v23  ;;  %v670_v24 = vmul.f32 %v2427_v37, %v2427_v37  ;;  %701 = vadd.xlane.f32.xlu1 %v700_v19  ;;  %v669_v0 = vmul.f32 %v2425_v23, %v2425_v23  ;;  %v653_v19 = vmul.f32 %v2287_v53, %v2287_v53  ;;  %v723_v49 = vsel %vm343_vm0, %v660_v51, 0.0 }
 0x213   :  { %2868 = vst [vmem:[#allocation32_spill] sm:$0xff] %v2427_v37 }
 0x214   :  { %v743_v3 = vsel %vm343_vm0, %v670_v24, 0.0  ;;  %v712_v15 = vadd.f32 %v711_v14, %v653_v19  ;;  %v543_v24 = vpop.permute.xlu0 %542 }
 0x215   :  { %v744_v26 = vadd.f32 %v743_v3, %v669_v0  ;;  %v659_v0 = vmul.f32 %v2448_v34, %v2448_v34  ;;  %v2455_v3 = vsub.f32 %v2329_v47, %v543_v24  ;;  %v2459_v2 = vsub.f32 %v2331_v44, %v543_v24 }
 0x217   :  { %745 = vadd.xlane.f32.xlu0 %v744_v26  ;;  %2869 = vst [vmem:[#allocation33_spill] sm:$0xff] %v2455_v3  ;;  %v724_v26 = vadd.f32 %v723_v49, %v659_v0  ;;  %v666_v46 = vmul.f32 %v2455_v3, %v2455_v3 }
 0x218   :  { %2870 = vst [vmem:[#allocation34_spill] sm:$0xff] %v2459_v2 }
 0x219   :  { %v735_v47 = vsel %vm343_vm0, %v666_v46, 0.0 }
 0x21a   :  { %773 = vadd.xlane.f32.xlu1 %v772_v4  ;;  %v665_v4 = vmul.f32 %v2459_v2, %v2459_v2 }
 0x21c   :  { %v558_v25 = vpop.permute.xlu0 %557  ;;  %v736_v19 = vadd.f32 %v735_v47, %v665_v4 }
 0x21d   :  { %v2466_v16 = vsub.f32 %v2393_v40, %v558_v25  ;;  %v2470_v20 = vsub.f32 %v2395_v42, %v558_v25 }
 0x21f   :  { %2871 = vst [vmem:[#allocation35_spill] sm:$0xff] %v2466_v16  ;;  %v672_v44 = vmul.f32 %v2466_v16, %v2466_v16  ;;  %v671_v14 = vmul.f32 %v2470_v20, %v2470_v20 }
 0x220   :  { %2872 = vst [vmem:[#allocation36_spill] sm:$0xff] %v2470_v20 }
 0x222   :  { %713 = vadd.xlane.f32.xlu1 %v712_v15  ;;  %v747_v15 = vsel %vm343_vm0, %v672_v44, 0.0 }
 0x223   :  { %v748_v51 = vadd.f32 %v747_v15, %v671_v14 }
 0x22a   :  { %725 = vadd.xlane.f32.xlu1 %v724_v26 }
 0x232   :  { %737 = vadd.xlane.f32.xlu1 %v736_v19 }
 0x23a   :  { %v690_v24 = vpop.xlane.xlu1 %689  ;;  %749 = vadd.xlane.f32.xlu1 %v748_v51 }
 0x23b   :  { %v779_v47 = vmul.f32 0.0051020407, %v690_v24 }
 0x23d   :  { %v2477_v14 = vadd.f32 0.001, %v779_v47 }
 0x242   :  { %v762_v40 = vpop.xlane.xlu1 %761  ;;  %v694_v0 = vpop.xlane.xlu0 %693 }
 0x243   :  { %v797_v49 = vmul.f32 0.0051020407, %v762_v40  ;;  %v780_v26 = vmul.f32 0.0051020407, %v694_v0 }
 0x245   :  { %v820_v46 = vadd.f32 0.001, %v797_v49  ;;  %v803_v42 = vadd.f32 0.001, %v780_v26 }
 0x247   :  { %1600 = vrsqrt.f32 %v820_v46  ;;  %vm841_vm4 = vweird.f32 %v803_v42  ;;  %vm1011_vm5 = vweird.f32 %v820_v46 }
 0x248   :  { %1602 = vrsqrt.f32 %v803_v42 }
 0x249   :  { %v766_v25 = vpop.xlane.xlu2 %765 }
 0x24a   :  { %v798_v4 = vmul.f32 0.0051020407, %v766_v25  ;;  %v770_v0 = vpop.xlane.xlu0 %769 }
 0x24b   :  { %v799_v3 = vmul.f32 0.0051020407, %v770_v0 }
 0x24c   :  { %v821_v19 = vadd.f32 0.001, %v798_v4 }
 0x24d   :  { %v1601_v37 = vpop.eup %1600 }
 0x24e   :  { %v1603_v23 = vpop.eup %1602  ;;  %v1006_v58 = vmul.f32 %v1601_v37, %v820_v46  ;;  %1604 = vrsqrt.f32 %v821_v19  ;;  %vm1012_vm3 = vweird.f32 %v1601_v37  ;;  %vm1021_vm9 = vweird.f32 %v821_v19 }
 0x24f   :  { %v836_v44 = vmul.f32 %v1603_v23, %v803_v42  ;;  %1606 = vrsqrt.f32 %v2477_v14  ;;  %vm842_vm2 = vweird.f32 %v1603_v23  ;;  %vm2483_vm7 = vmor %vm1011_vm5, %vm1012_vm3  ;;  %vm831_vm3 = vweird.f32 %v2477_v14 }
 0x250   :  { %v1007_v15 = vmul.f32 %v1601_v37, %v1006_v58  ;;  %vm843_vm6 = vmor %vm841_vm4, %vm842_vm2 }
 0x251   :  { %v837_v51 = vmul.f32 %v1603_v23, %v836_v44  ;;  %v698_v62 = vpop.xlane.xlu2 %697  ;;  %v239_v44 = vpop.f32.mrf.mxu0 }
 0x252   :  { %v1008_v40 = vmul.f32 0.5, %v1007_v15  ;;  %v781_v49 = vmul.f32 0.0051020407, %v698_v62  ;;  %v325_v62 = vpop.f32.mrf.mxu1 }
 0x253   :  { %v838_v26 = vmul.f32 0.5, %v837_v51 }
 0x254   :  { %v1605_v16 = vpop.eup %1604  ;;  %v1009_v25 = vsub.f32 1.5, %v1008_v40  ;;  %v2480_v24 = vadd.f32 0.001, %v781_v49  ;;  %v2487_v49 = vadd.f32 0.001, %v799_v3 }
 0x255   :  { %v839_v4 = vsub.f32 1.5, %v838_v26  ;;  %v1016_v20 = vmul.f32 %v1605_v16, %v821_v19  ;;  %v2489_v2 = vpop.eup %1606  ;;  %vm1022_vm8 = vweird.f32 %v1605_v16 }
 0x256   :  { %1608 = vrsqrt.f32 %v2480_v24  ;;  %v1010_v15 = vmul.f32 %v1601_v37, %v1009_v25  ;;  %vm1023_vm10 = vmor %vm1021_vm9, %vm1022_vm8  ;;  %vm851_vm12 = vweird.f32 %v2480_v24  ;;  %vm832_vm1 = vweird.f32 %v2489_v2 }
 0x257   :  { %v1017_v58 = vmul.f32 %v1605_v16, %v1016_v20  ;;  %v840_v47 = vmul.f32 %v1603_v23, %v839_v4  ;;  %1610 = vrsqrt.f32 %v2487_v49  ;;  %vm833_vm4 = vmor %vm831_vm3, %vm832_vm1  ;;  %vm1031_vm9 = vweird.f32 %v2487_v49 }
 0x258   :  { %v1014_v46 = vsel %vm2483_vm7, %v1601_v37, %v1010_v15  ;;  %v826_v37 = vmul.f32 %v2489_v2, %v2477_v14 }
 0x259   :  { %v1018_v40 = vmul.f32 0.5, %v1017_v58  ;;  %v706_v26 = vpop.xlane.xlu2 %705  ;;  %v844_v0 = vsel %vm843_vm6, %v1603_v23, %v840_v47  ;;  %v1096_v3 = vmul.f32 %v2141_v22, %v1014_v46 }
 0x25a   :  { %v783_v18 = vmul.f32 0.0051020407, %v706_v26  ;;  %v568_v42 = vpop.permute.xlu1 %567  ;;  %v1079_v20 = vmul.f32 %v2038_v57, %v844_v0 }
 0x25b   :  { %v2494_v4 = vsub.f32 %v325_v62, %v568_v42  ;;  %v2496_v25 = vsub.f32 %v239_v44, %v568_v42  ;;  %v1019_v31 = vsub.f32 1.5, %v1018_v40  ;;  %1193 = vperm.xlu2 %1596, %v1096_v3   ;;  %v827_v40 = vmul.f32 %v2489_v2, %v826_v37 }
 0x25c   :  { %v1609_v5 = vpop.eup %1608  ;;  %v806_v58 = vadd.f32 0.001, %v783_v18  ;;  %1108 = vperm.xlu1 %1594, %v1079_v20  }
 0x25d   :  { %v846_v23 = vmul.f32 %v1609_v5, %v2480_v24  ;;  %v676_v57 = vmul.f32 %v2494_v4, %v2494_v4  ;;  %v675_v18 = vmul.f32 %v2496_v25, %v2496_v25  ;;  %v1020_v62 = vmul.f32 %v1605_v16, %v1019_v31  ;;  %v2509_v42 = vpop.eup %1610 }
 0x25e   :  { %1612 = vrsqrt.f32 %v806_v58  ;;  %vm852_vm11 = vweird.f32 %v1609_v5  ;;  %v1026_v37 = vmul.f32 %v2509_v42, %v2487_v49  ;;  %vm871_vm15 = vweird.f32 %v806_v58 }
 0x25f   :  { %v847_v47 = vmul.f32 %v1609_v5, %v846_v23  ;;  %v755_v22 = vsel %vm343_vm0, %v676_v57, 0.0  ;;  %v1024_v0 = vsel %vm1023_vm10, %v1605_v16, %v1020_v62  ;;  %v828_v57 = vmul.f32 0.5, %v827_v40  ;;  %vm853_vm13 = vmor %vm851_vm12, %vm852_vm11 }
 0x260   :  { %v756_v51 = vadd.f32 %v755_v22, %v675_v18  ;;  %v1097_v46 = vmul.f32 %v2098_v11, %v1024_v0  ;;  %vm1032_vm7 = vweird.f32 %v2509_v42 }
 0x261   :  { %v848_v44 = vmul.f32 0.5, %v847_v47  ;;  %v778_v15 = vpop.xlane.xlu2 %777  ;;  %v829_v11 = vsub.f32 1.5, %v828_v57  ;;  %vm1033_vm10 = vmor %vm1031_vm9, %vm1032_vm7 }
 0x262   :  { %v801_v26 = vmul.f32 0.0051020407, %v778_v15  ;;  %757 = vadd.xlane.f32.xlu0 %v756_v51 }
 0x263   :  { %v849_v20 = vsub.f32 1.5, %v848_v44  ;;  %v1027_v44 = vmul.f32 %v2509_v42, %v1026_v37 }
 0x264   :  { %v1613_v3 = vpop.eup %1612  ;;  %v824_v19 = vadd.f32 0.001, %v801_v26  ;;  %1198 = vperm.xlu1 %1594, %v1097_v46  }
 0x265   :  { %v866_v31 = vmul.f32 %v1613_v3, %v806_v58  ;;  %v850_v23 = vmul.f32 %v1609_v5, %v849_v20  ;;  %vm872_vm14 = vweird.f32 %v1613_v3  ;;  %v1028_v20 = vmul.f32 0.5, %v1027_v44 }
 0x266   :  { %1614 = vrsqrt.f32 %v824_v19  ;;  %vm873_vm2 = vmor %vm871_vm15, %vm872_vm14  ;;  %vm1051_vm6 = vweird.f32 %v824_v19 }
 0x267   :  { %v867_v16 = vmul.f32 %v1613_v3, %v866_v31  ;;  %v854_v47 = vsel %vm853_vm13, %v1609_v5, %v850_v23  ;;  %v1029_v37 = vsub.f32 1.5, %v1028_v20 }
 0x268   :  { %v1080_v18 = vmul.f32 %v1996_v48, %v854_v47  ;;  %v830_v48 = vmul.f32 %v2489_v2, %v829_v11 }
 0x269   :  { %v868_v22 = vmul.f32 0.5, %v867_v16  ;;  %v718_v62 = vpop.xlane.xlu2 %717 }
 0x26a   :  { %v786_v15 = vmul.f32 0.0051020407, %v718_v62  ;;  %1113 = vperm.xlu2 %1596, %v1080_v18   ;;  %v834_v16 = vsel %vm833_vm4, %v2489_v2, %v830_v48  ;;  %v710_v62 = vpop.xlane.xlu0 %709  ;;  %v1030_v2 = vmul.f32 %v2509_v42, %v1029_v37  ;;  %v2536_v48 = vld [vmem:[%s2805_s3 + $0xa0] sm:$0xff] }
 0x26b   :  { %v869_v24 = vsub.f32 1.5, %v868_v22 }
 0x26c   :  { %v1615_v51 = vpop.eup %1614  ;;  %v809_v40 = vadd.f32 0.001, %v786_v15  ;;  %v1034_v20 = vsel %vm1033_vm10, %v2509_v42, %v1030_v2 }
 0x26d   :  { %v1046_v26 = vmul.f32 %v1615_v51, %v824_v19  ;;  %v870_v0 = vmul.f32 %v1613_v3, %v869_v24  ;;  %vm1052_vm5 = vweird.f32 %v1615_v51  ;;  %v784_v19 = vmul.f32 0.0051020407, %v710_v62 }
 0x26e   :  { %1616 = vrsqrt.f32 %v809_v40  ;;  %vm1053_vm8 = vmor %vm1051_vm6, %vm1052_vm5  ;;  %vm901_vm12 = vweird.f32 %v809_v40 }
 0x26f   :  { %v1047_v5 = vmul.f32 %v1615_v51, %v1046_v26  ;;  %v874_v46 = vsel %vm873_vm2, %v1613_v3, %v870_v0  ;;  %v1078_v3 = vmul.f32 %v2046_v59, %v834_v16  ;;  %v1646_v16 = vld [vmem:[%s2805_s3 + $0x38] sm:$0xff] }
 0x270   :  { %v1082_v31 = vmul.f32 %v2015_v52, %v874_v46  ;;  %v2526_v52 = vld [vmem:[%s2805_s3 + $0xb0] sm:$0xff]  ;;  %v2538_v46 = vadd.f32 0.001, %v784_v19 }
 0x271   :  { %v1048_v23 = vmul.f32 0.5, %v1047_v5  ;;  %v730_v57 = vpop.xlane.xlu2 %729 }
 0x272   :  { %v789_v58 = vmul.f32 0.0051020407, %v730_v57  ;;  %1123 = vperm.xlu1 %1594, %v1082_v31  }
 0x273   :  { %v1049_v47 = vsub.f32 1.5, %v1048_v23  ;;  %v1098_v23 = vmul.f32 %v2536_v48, %v1034_v20 }
 0x274   :  { %v1617_v18 = vpop.eup %1616  ;;  %v812_v22 = vadd.f32 0.001, %v789_v58  ;;  %v722_v58 = vpop.xlane.xlu0 %721 }
 0x275   :  { %v896_v11 = vmul.f32 %v1617_v18, %v809_v40  ;;  %v1050_v14 = vmul.f32 %v1615_v51, %v1049_v47  ;;  %vm902_vm11 = vweird.f32 %v1617_v18 }
 0x276   :  { %1618 = vrsqrt.f32 %v812_v22  ;;  %1103 = vperm.xlu0 %1595, %v1078_v3   ;;  %vm903_vm13 = vmor %vm901_vm12, %vm902_vm11  ;;  %vm931_vm15 = vweird.f32 %v812_v22  ;;  %vm881_vm12 = vweird.f32 %v2538_v46 }
 0x277   :  { %v897_v44 = vmul.f32 %v1617_v18, %v896_v11  ;;  %v1054_v15 = vsel %vm1053_vm8, %v1615_v51, %v1050_v14  ;;  %v787_v11 = vmul.f32 0.0051020407, %v722_v58 }
 0x278   :  { %v1100_v59 = vmul.f32 %v2526_v52, %v1054_v15 }
 0x279   :  { %v898_v24 = vmul.f32 0.5, %v897_v44  ;;  %v742_v26 = vpop.xlane.xlu2 %741 }
 0x27a   :  { %v792_v0 = vmul.f32 0.0051020407, %v742_v26  ;;  %1213 = vperm.xlu1 %1594, %v1100_v59   ;;  %v2547_v26 = vadd.f32 0.001, %v787_v11 }
 0x27b   :  { %v899_v5 = vsub.f32 1.5, %v898_v24 }
 0x27c   :  { %v1619_v51 = vpop.eup %1618  ;;  %v815_v49 = vadd.f32 0.001, %v792_v0 }
 0x27d   :  { %v926_v31 = vmul.f32 %v1619_v51, %v812_v22  ;;  %v900_v57 = vmul.f32 %v1617_v18, %v899_v5  ;;  %vm932_vm14 = vweird.f32 %v1619_v51  ;;  %v734_v5 = vpop.xlane.xlu0 %733 }
 0x27e   :  { %1620 = vrsqrt.f32 %v815_v49  ;;  %1203 = vperm.xlu0 %1595, %v1098_v23   ;;  %vm933_vm1 = vmor %vm931_vm15, %vm932_vm14  ;;  %v1647_v23 = vld [vmem:[%s2805_s3 + $0x50] sm:$0xff]  ;;  %vm961_vm3 = vweird.f32 %v815_v49 }
 0x27f   :  { %v927_v37 = vmul.f32 %v1619_v51, %v926_v31  ;;  %v904_v42 = vsel %vm903_vm13, %v1617_v18, %v900_v57  ;;  %1622 = vrsqrt.f32 %v2538_v46 }
 0x280   :  { %v1085_v47 = vmul.f32 %v1646_v16, %v904_v42  ;;  %v790_v42 = vmul.f32 0.0051020407, %v734_v5 }
 0x281   :  { %v928_v62 = vmul.f32 0.5, %v927_v37 }
 0x282   :  { %1138 = vperm.xlu1 %1594, %v1085_v47   ;;  %v754_v40 = vpop.xlane.xlu2 %753 }
 0x283   :  { %v929_v3 = vsub.f32 1.5, %v928_v62  ;;  %v795_v14 = vmul.f32 0.0051020407, %v754_v40 }
 0x284   :  { %v1621_v2 = vpop.eup %1620 }
 0x285   :  { %v956_v44 = vmul.f32 %v1621_v2, %v815_v49  ;;  %v818_v15 = vadd.f32 0.001, %v795_v14  ;;  %v702_v18 = vpop.xlane.xlu1 %701  ;;  %v930_v19 = vmul.f32 %v1619_v51, %v929_v3  ;;  %v2545_v24 = vpop.eup %1622  ;;  %vm962_vm2 = vweird.f32 %v1621_v2 }
 0x286   :  { %v782_v59 = vmul.f32 0.0051020407, %v702_v18  ;;  %v876_v37 = vmul.f32 %v2545_v24, %v2538_v46  ;;  %vm963_vm4 = vmor %vm961_vm3, %vm962_vm2  ;;  %v2556_v3 = vadd.f32 0.001, %v790_v42  ;;  %vm882_vm11 = vweird.f32 %v2545_v24  ;;  %v2608_v46 = vld [vmem:[%s2805_s3 + $0xa8] sm:$0xff] }
 0x287   :  { %v957_v0 = vmul.f32 %v1621_v2, %v956_v44  ;;  %1624 = vrsqrt.f32 %v818_v15  ;;  %v934_v20 = vsel %vm933_vm1, %v1619_v51, %v930_v19  ;;  %vm991_vm5 = vweird.f32 %v818_v15  ;;  %vm2596_vm14 = vmor %vm881_vm12, %vm882_vm11 }
 0x288   :  { %v805_v31 = vadd.f32 0.001, %v782_v59  ;;  %v1088_v22 = vmul.f32 %v1647_v23, %v934_v20  ;;  %v877_v11 = vmul.f32 %v2545_v24, %v876_v37  ;;  %v1648_v59 = vld [vmem:[%s2805_s3 + $0x68] sm:$0xff]  ;;  %vm911_vm3 = vweird.f32 %v2547_v26 }
 0x289   :  { %v958_v57 = vmul.f32 0.5, %v957_v0 }
 0x28a   :  { %1626 = vrsqrt.f32 %v805_v31  ;;  %1153 = vperm.xlu1 %1594, %v1088_v22   ;;  %v746_v5 = vpop.xlane.xlu0 %745  ;;  %vm861_vm9 = vweird.f32 %v805_v31 }
 0x28b   :  { %1628 = vrsqrt.f32 %v2547_v26  ;;  %v959_v58 = vsub.f32 1.5, %v958_v57  ;;  %v793_v42 = vmul.f32 0.0051020407, %v746_v5 }
 0x28d   :  { %v1625_v16 = vpop.eup %1624  ;;  %v774_v51 = vpop.xlane.xlu1 %773  ;;  %v960_v47 = vmul.f32 %v1621_v2, %v959_v58 }
 0x28e   :  { %v986_v62 = vmul.f32 %v1625_v16, %v818_v15  ;;  %v800_v40 = vmul.f32 0.0051020407, %v774_v51  ;;  %vm992_vm6 = vweird.f32 %v1625_v16 }
 0x28f   :  { %v964_v14 = vsel %vm963_vm4, %v1621_v2, %v960_v47  ;;  %v878_v2 = vmul.f32 0.5, %v877_v11  ;;  %vm2569_vm7 = vmor %vm991_vm5, %vm992_vm6 }
 0x290   :  { %v1627_v44 = vpop.eup %1626  ;;  %v987_v18 = vmul.f32 %v1625_v16, %v986_v62  ;;  %v2558_v19 = vadd.f32 0.001, %v800_v40  ;;  %v1091_v0 = vmul.f32 %v1648_v59, %v964_v14  ;;  %v2574_v59 = vadd.f32 0.001, %v793_v42 }
 0x291   :  { %v2563_v49 = vpop.eup %1628  ;;  %v856_v20 = vmul.f32 %v1627_v44, %v805_v31  ;;  %v879_v40 = vsub.f32 1.5, %v878_v2  ;;  %vm862_vm8 = vweird.f32 %v1627_v44  ;;  %v1649_v2 = vld [vmem:[%s2805_s3 + $0x80] sm:$0xff]  ;;  %v1650_v31 = vld [vmem:[%s2805_s3 + $0x18] sm:$0xff] }
 0x292   :  { %v988_v23 = vmul.f32 0.5, %v987_v18  ;;  %1630 = vrsqrt.f32 %v2558_v19  ;;  %1168 = vperm.xlu1 %1594, %v1091_v0   ;;  %v906_v57 = vmul.f32 %v2563_v49, %v2547_v26  ;;  %vm863_vm10 = vmor %vm861_vm9, %vm862_vm8  ;;  %vm1041_vm15 = vweird.f32 %v2558_v19 }
 0x293   :  { %1632 = vrsqrt.f32 %v2556_v3  ;;  %v857_v22 = vmul.f32 %v1627_v44, %v856_v20  ;;  %vm912_vm2 = vweird.f32 %v2563_v49  ;;  %vm941_vm9 = vweird.f32 %v2556_v3 }
 0x294   :  { %v989_v37 = vsub.f32 1.5, %v988_v23  ;;  %v907_v18 = vmul.f32 %v2563_v49, %v906_v57  ;;  %vm2629_vm4 = vmor %vm911_vm3, %vm912_vm2 }
 0x295   :  { %v858_v51 = vmul.f32 0.5, %v857_v22  ;;  %v714_v47 = vpop.xlane.xlu1 %713 }
 0x296   :  { %v785_v15 = vmul.f32 0.0051020407, %v714_v47  ;;  %v990_v62 = vmul.f32 %v1625_v16, %v989_v37 }
 0x297   :  { %v859_v14 = vsub.f32 1.5, %v858_v51  ;;  %v908_v51 = vmul.f32 0.5, %v907_v18 }
 0x298   :  { %v1631_v11 = vpop.eup %1630  ;;  %v2576_v0 = vadd.f32 0.001, %v785_v15  ;;  %v994_v20 = vsel %vm2569_vm7, %v1625_v16, %v990_v62  ;;  %v880_v62 = vmul.f32 %v2545_v24, %v879_v40 }
 0x299   :  { %v2580_v5 = vpop.eup %1632  ;;  %v1036_v23 = vmul.f32 %v1631_v11, %v2558_v19  ;;  %v1094_v22 = vmul.f32 %v1649_v2, %v994_v20  ;;  %v860_v37 = vmul.f32 %v1627_v44, %v859_v14  ;;  %vm1042_vm13 = vweird.f32 %v1631_v11 }
 0x29a   :  { %1634 = vrsqrt.f32 %v2576_v0  ;;  %v936_v16 = vmul.f32 %v2580_v5, %v2556_v3  ;;  %vm1043_vm1 = vmor %vm1041_vm15, %vm1042_vm13  ;;  %vm891_vm6 = vweird.f32 %v2576_v0  ;;  %vm942_vm8 = vweird.f32 %v2580_v5 }
 0x29b   :  { %v1037_v57 = vmul.f32 %v1631_v11, %v1036_v23  ;;  %1183 = vperm.xlu1 %1594, %v1094_v22   ;;  %v864_v42 = vsel %vm863_vm10, %v1627_v44, %v860_v37  ;;  %1636 = vrsqrt.f32 %v2574_v59  ;;  %v909_v23 = vsub.f32 1.5, %v908_v51  ;;  %vm2648_vm10 = vmor %vm941_vm9, %vm942_vm8 }
 0x29c   :  { %v1081_v58 = vmul.f32 %v1650_v31, %v864_v42  ;;  %v937_v2 = vmul.f32 %v2580_v5, %v936_v16  ;;  %v2879_v51 = vmov 1   ;;  %vm971_vm15 = vweird.f32 %v2574_v59 }
 0x29d   :  { %v1038_v47 = vmul.f32 0.5, %v1037_v57  ;;  %v726_v15 = vpop.xlane.xlu1 %725  ;;  %v884_v57 = vsel %vm2596_vm14, %v2545_v24, %v880_v62  ;;  %v1651_v24 = vld [vmem:[%s2805_s3 + $0x28] sm:$0xff] }
 0x29e   :  { %v788_v14 = vmul.f32 0.0051020407, %v726_v15  ;;  %1118 = vperm.xlu0 %1595, %v1081_v58   ;;  %v938_v31 = vmul.f32 0.5, %v937_v2  ;;  %v910_v15 = vmul.f32 %v2563_v49, %v909_v23 }
 0x29f   :  { %v1039_v44 = vsub.f32 1.5, %v1038_v47  ;;  %v1083_v47 = vmul.f32 %v1651_v24, %v884_v57 }
 0x2a0   :  { %v1635_v18 = vpop.eup %1634  ;;  %v2601_v22 = vadd.f32 0.001, %v788_v14  ;;  %v939_v23 = vsub.f32 1.5, %v938_v31  ;;  %v1652_v31 = vld [vmem:[%s2805_s3 + $0x30] sm:$0xff] }
 0x2a1   :  { %v886_v40 = vmul.f32 %v1635_v18, %v2576_v0  ;;  %v1040_v37 = vmul.f32 %v1631_v11, %v1039_v44  ;;  %v2613_v42 = vpop.eup %1636  ;;  %vm892_vm5 = vweird.f32 %v1635_v18 }
 0x2a2   :  { %1638 = vrsqrt.f32 %v2601_v22  ;;  %v966_v62 = vmul.f32 %v2613_v42, %v2574_v59  ;;  %vm893_vm7 = vmor %vm891_vm6, %vm892_vm5  ;;  %v940_v0 = vmul.f32 %v2580_v5, %v939_v23  ;;  %vm921_vm12 = vweird.f32 %v2601_v22 }
 0x2a3   :  { %v887_v19 = vmul.f32 %v1635_v18, %v886_v40  ;;  %1599 = vset.pattern.permute.xlu1 %v2879_v51  ;;  %v1044_v16 = vsel %vm1043_vm1, %v1631_v11, %v1040_v37  ;;  %v914_v37 = vsel %vm2629_vm4, %v2563_v49, %v910_v15  ;;  %v1653_v49 = vld [vmem:[%s2805_s3 + $0x40] sm:$0xff]  ;;  %vm972_vm14 = vweird.f32 %v2613_v42 }
 0x2a4   :  { %1374 = vperm.xlu1 %1599, %v2526_v52   ;;  %v1099_v58 = vmul.f32 %v2608_v46, %v1044_v16  ;;  %v967_v26 = vmul.f32 %v2613_v42, %v966_v62  ;;  %v944_v23 = vsel %vm2648_vm10, %v2580_v5, %v940_v0  ;;  %vm973_vm1 = vmor %vm971_vm15, %vm972_vm14 }
 0x2a5   :  { %v888_v14 = vmul.f32 0.5, %v887_v19  ;;  %v738_v44 = vpop.xlane.xlu1 %737 }
 0x2a6   :  { %v791_v11 = vmul.f32 0.0051020407, %v738_v44  ;;  %1208 = vperm.xlu2 %1596, %v1099_v58   ;;  %1128 = vperm.xlu0 %1595, %v1083_v47   ;;  %v1086_v47 = vmul.f32 %v1653_v49, %v914_v37  ;;  %v968_v15 = vmul.f32 0.5, %v967_v26 }
 0x2a7   :  { %v889_v20 = vsub.f32 1.5, %v888_v14 }
 0x2a8   :  { %v1639_v2 = vpop.eup %1638  ;;  %v814_v40 = vadd.f32 0.001, %v791_v11  ;;  %v969_v37 = vsub.f32 1.5, %v968_v15 }
 0x2a9   :  { %v916_v57 = vmul.f32 %v1639_v2, %v2601_v22  ;;  %v890_v19 = vmul.f32 %v1635_v18, %v889_v20  ;;  %vm922_vm11 = vweird.f32 %v1639_v2 }
 0x2aa   :  { %1640 = vrsqrt.f32 %v814_v40  ;;  %vm923_vm13 = vmor %vm921_vm12, %vm922_vm11  ;;  %v970_v22 = vmul.f32 %v2613_v42, %v969_v37  ;;  %vm951_vm3 = vweird.f32 %v814_v40  ;;  %v1656_v37 = vld [vmem:[%s2805_s3 + $0x70] sm:$0xff] }
 0x2ab   :  { %v917_v16 = vmul.f32 %v1639_v2, %v916_v57  ;;  %v894_v58 = vsel %vm893_vm7, %v1635_v18, %v890_v19 }
 0x2ac   :  { %v1084_v24 = vmul.f32 %v1652_v31, %v894_v58  ;;  %v1655_v31 = vld [vmem:[%s2805_s3 + $0x58] sm:$0xff] }
 0x2ad   :  { %v918_v62 = vmul.f32 0.5, %v917_v16  ;;  %v750_v14 = vpop.xlane.xlu1 %749  ;;  %v1654_v16 = vld [vmem:[%s2805_s3 + $0x48] sm:$0xff] }
 0x2ae   :  { %v794_v18 = vmul.f32 0.0051020407, %v750_v14  ;;  %1133 = vperm.xlu2 %1596, %v1084_v24   ;;  %1143 = vperm.xlu0 %1595, %v1086_v47   ;;  %v1089_v24 = vmul.f32 %v1655_v31, %v944_v23  ;;  %v974_v14 = vsel %vm973_vm1, %v2613_v42, %v970_v22 }
 0x2af   :  { %v919_v11 = vsub.f32 1.5, %v918_v62 }
 0x2b0   :  { %v1641_v52 = vpop.eup %1640  ;;  %v817_v20 = vadd.f32 0.001, %v794_v18 }
 0x2b1   :  { %v946_v26 = vmul.f32 %v1641_v52, %v814_v40  ;;  %v920_v3 = vmul.f32 %v1639_v2, %v919_v11  ;;  %vm952_vm2 = vweird.f32 %v1641_v52 }
 0x2b2   :  { %1642 = vrsqrt.f32 %v817_v20  ;;  %vm953_vm4 = vmor %vm951_vm3, %vm952_vm2  ;;  %vm981_vm6 = vweird.f32 %v817_v20 }
 0x2b3   :  { %v947_v57 = vmul.f32 %v1641_v52, %v946_v26  ;;  %v924_v19 = vsel %vm923_vm13, %v1639_v2, %v920_v3  ;;  %v1092_v26 = vmul.f32 %v1656_v37, %v974_v14 }
 0x2b4   :  { %v1087_v58 = vmul.f32 %v1654_v16, %v924_v19 }
 0x2b5   :  { %v948_v5 = vmul.f32 0.5, %v947_v57  ;;  %v1194_v47 = vpop.permute.xlu2 %1193  ;;  %v1658_v57 = vld [vmem:[%s2805_s3 + $0x78] sm:$0xff] }
 0x2b6   :  { %1148 = vperm.xlu2 %1596, %v1087_v58   ;;  %1158 = vperm.xlu0 %1595, %v1089_v24   ;;  %v1252_v15 = vmul.f32 %v1194_v47, %v2253_v7  ;;  %v1253_v62 = vmul.f32 %v1194_v47, %v2246_v29  ;;  %v1657_v29 = vld [vmem:[%s2805_s3 + $0x60] sm:$0xff] }
 0x2b7   :  { %v949_v2 = vsub.f32 1.5, %v948_v5 }
 0x2b8   :  { %v1643_v49 = vpop.eup %1642  ;;  %v1413_v11 = vadd.f32 %v2189_v8, %v1252_v15  ;;  %v1414_v59 = vadd.f32 %v2189_v8, %v1253_v62 }
 0x2b9   :  { %v976_v0 = vmul.f32 %v1643_v49, %v817_v20  ;;  %v950_v18 = vmul.f32 %v1641_v52, %v949_v2  ;;  %vm982_vm5 = vweird.f32 %v1643_v49 }
 0x2ba   :  { %1459 = vst [vmem:[#allocation2 + $0x120] sm:$0xff] %v1413_v11  ;;  %vm983_vm7 = vmor %vm981_vm6, %vm982_vm5 }
 0x2bb   :  { %v977_v44 = vmul.f32 %v1643_v49, %v976_v0  ;;  %v954_v23 = vsel %vm953_vm4, %v1641_v52, %v950_v18  ;;  %1460 = vst.msk [vmem:[#allocation2 + $0x128] sm:$0xff] %vm343_vm0, %v1414_v59 }
 0x2bc   :  { %v1090_v7 = vmul.f32 %v1657_v29, %v954_v23 }
 0x2bd   :  { %v978_v3 = vmul.f32 0.5, %v977_v44 }
 0x2be   :  { %1173 = vperm.xlu0 %1595, %v1092_v26   ;;  %1163 = vperm.xlu2 %1596, %v1090_v7  }
 0x2bf   :  { %v979_v42 = vsub.f32 1.5, %v978_v3 }
 0x2c1   :  { %v980_v8 = vmul.f32 %v1643_v49, %v979_v42 }
 0x2c3   :  { %v984_v40 = vsel %vm983_vm7, %v1643_v49, %v980_v8 }
 0x2c4   :  { %v1114_v52 = vpop.permute.xlu2 %1113  ;;  %v1093_v19 = vmul.f32 %v1658_v57, %v984_v40 }
 0x2c5   :  { %v1220_v16 = vmul.f32 %v1114_v52, %v2306_v33  ;;  %v1221_v58 = vmul.f32 %v1114_v52, %v2294_v61 }
 0x2c6   :  { %1178 = vperm.xlu2 %1596, %v1093_v19   ;;  %v2884_v19 = vld [vmem:[#allocation11_spill] sm:$0xff] }
 0x2c7   :  { %v1381_v31 = vadd.f32 %v2177_v54, %v1220_v16  ;;  %v1382_v24 = vadd.f32 %v2177_v54, %v1221_v58  ;;  %v2885_v58 = vld [vmem:[#allocation13_spill] sm:$0xff] }
 0x2c9   :  { %1427 = vst [vmem:[#allocation2 + $0x20] sm:$0xff] %v1381_v31 }
 0x2ca   :  { %1428 = vst.msk [vmem:[#allocation2 + $0x28] sm:$0xff] %vm343_vm0, %v1382_v24 }
 0x2ce   :  { %v1109_v20 = vpop.permute.xlu1 %1108  ;;  %1598 = vset.pattern.permute.xlu2 %v2879_v51 }
 0x2cf   :  { %v1218_v5 = vmul.f32 %v1109_v20, %v2250_v45  ;;  %v1219_v22 = vmul.f32 %v1109_v20, %v2243_v39  ;;  %1369 = vperm.xlu2 %1598, %v2608_v46  }
 0x2d1   :  { %v1379_v33 = vadd.f32 %v2165_v35, %v1218_v5  ;;  %v1380_v61 = vadd.f32 %v2165_v35, %v1219_v22  ;;  %v2886_v22 = vld [vmem:[#allocation6_spill] sm:$0xff] }
 0x2d3   :  { %1425 = vst [vmem:[#allocation2 + $0x10] sm:$0xff] %v1379_v33 }
 0x2d4   :  { %1426 = vst.msk [vmem:[#allocation2 + $0x18] sm:$0xff] %vm343_vm0, %v1380_v61 }
 0x2d5   :  { %v758_v54 = vpop.xlane.xlu0 %757 }
 0x2d6   :  { %v1199_v2 = vpop.permute.xlu1 %1198  ;;  %v796_v49 = vmul.f32 0.0051020407, %v758_v54 }
 0x2d7   :  { %v1254_v47 = vmul.f32 %v1199_v2, %v2278_v43  ;;  %v1255_v45 = vmul.f32 %v1199_v2, %v2264_v50  ;;  %v2887_v2 = vld [vmem:[#allocation16_spill] sm:$0xff] }
 0x2d8   :  { %v819_v0 = vadd.f32 0.001, %v796_v49 }
 0x2d9   :  { %v1415_v39 = vadd.f32 %v2223_v56, %v1254_v47  ;;  %v1416_v15 = vadd.f32 %v2223_v56, %v1255_v45 }
 0x2da   :  { %1644 = vrsqrt.f32 %v819_v0  ;;  %vm1001_vm9 = vweird.f32 %v819_v0 }
 0x2db   :  { %1461 = vst [vmem:[#allocation2 + $0x130] sm:$0xff] %v1415_v39 }
 0x2dc   :  { %1462 = vst.msk [vmem:[#allocation2 + $0x138] sm:$0xff] %vm343_vm0, %v1416_v15  ;;  %v2888_v15 = vld [vmem:[#allocation15_spill] sm:$0xff] }
 0x2e0   :  { %v1645_v35 = vpop.eup %1644 }
 0x2e1   :  { %v996_v46 = vmul.f32 %v1645_v35, %v819_v0  ;;  %vm1002_vm8 = vweird.f32 %v1645_v35 }
 0x2e2   :  { %vm1003_vm10 = vmor %vm1001_vm9, %vm1002_vm8 }
 0x2e3   :  { %v997_v62 = vmul.f32 %v1645_v35, %v996_v46 }
 0x2e4   :  { %v1124_v14 = vpop.permute.xlu1 %1123 }
 0x2e5   :  { %v1224_v18 = vmul.f32 %v1124_v14, %v2325_v27  ;;  %v1225_v44 = vmul.f32 %v1124_v14, %v2320_v60  ;;  %v998_v43 = vmul.f32 0.5, %v997_v62  ;;  %v2890_v62 = vld [vmem:[#allocation5_spill] sm:$0xff] }
 0x2e7   :  { %v1385_v50 = vadd.f32 %v2185_v63, %v1224_v18  ;;  %v1386_v11 = vadd.f32 %v2185_v63, %v1225_v44  ;;  %v999_v59 = vsub.f32 1.5, %v998_v43  ;;  %v1659_v63 = vld [vmem:[%s2805_s3 + $0x88] sm:$0xff]  ;;  %v2891_v44 = vld [vmem:[#allocation26_spill] sm:$0xff]  ;;  %s1688_s3 = smov [#allocation2]  }
 0x2e8   :  { %v1104_v56 = vpop.permute.xlu0 %1103  ;;  %s1473_s21 = sshll.u32 %s1688_s3, 4  ;;  %s1474_s21 = int_to_ptr.vmem [resolvable:$true] %s1473_s21 }
 0x2e9   :  { %1431 = vst [vmem:[#allocation2 + $0x40] sm:$0xff] %v1385_v50  ;;  %v1216_v23 = vmul.f32 %v1104_v56, %v2233_v21  ;;  %v1217_v37 = vmul.f32 %v1104_v56, %v2231_v13  ;;  %v1000_v26 = vmul.f32 %v1645_v35, %v999_v59 }
 0x2ea   :  { %1432 = vst.msk [vmem:[#allocation2 + $0x48] sm:$0xff] %vm343_vm0, %v1386_v11 }
 0x2eb   :  { %v1377_v60 = vadd.f32 %v2187_v1, %v1216_v23  ;;  %v1378_v27 = vadd.f32 %v2187_v1, %v1217_v37  ;;  %v1004_v29 = vsel %vm1003_vm10, %v1645_v35, %v1000_v26  ;;  %v2893_v23 = vld [vmem:[#allocation22_spill] sm:$0xff]  ;;  %v2894_v26 = vld [vmem:[#allocation21_spill] sm:$0xff] }
 0x2ec   :  { %v1214_v3 = vpop.permute.xlu1 %1213  ;;  %v1095_v7 = vmul.f32 %v1659_v63, %v1004_v29  ;;  %v2896_v29 = vld [vmem:[#allocation33_spill] sm:$0xff] }
 0x2ed   :  { %1423 = vst [vmem:[#allocation2] sm:$0xff] %v1377_v60  ;;  %v1260_v43 = vmul.f32 %v1214_v3, %v2891_v44 }
 0x2ee   :  { %1424 = vst.msk [vmem:[#allocation2 + $0x8] sm:$0xff] %vm343_vm0, %v1378_v27  ;;  %1188 = vperm.xlu0 %1595, %v1095_v7   ;;  %v2895_v27 = vld [vmem:[#allocation34_spill] sm:$0xff] }
 0x2ef   :  { %v2897_v7 = vld [vmem:[#allocation10_spill] sm:$0xff] }
 0x2f0   :  { %v2728_v24 = vpop.permute.xlu0 %1203 }
 0x2f4   :  { %v1139_v21 = vpop.permute.xlu1 %1138 }
 0x2f5   :  { %v1230_v13 = vmul.f32 %v1139_v21, %v2364_v12  ;;  %v1231_v42 = vmul.f32 %v1139_v21, %v2360_v9 }
 0x2f6   :  { %1597 = vset.pattern.permute.xlu0 %v2879_v51 }
 0x2f7   :  { %v1391_v8 = vadd.f32 %v2191_v10, %v1230_v13  ;;  %v1392_v1 = vadd.f32 %v2191_v10, %v1231_v42  ;;  %1364 = vperm.xlu0 %1597, %v2536_v48   ;;  %v2898_v13 = vld [vmem:[#allocation8_spill] sm:$0xff] }
 0x2f9   :  { %1437 = vst [vmem:[#allocation2 + $0x70] sm:$0xff] %v1391_v8 }
 0x2fa   :  { %1438 = vst.msk [vmem:[#allocation2 + $0x78] sm:$0xff] %vm343_vm0, %v1392_v1 }
 0x2fc   :  { %v1154_v40 = vpop.permute.xlu1 %1153 }
 0x2fd   :  { %v1236_v52 = vmul.f32 %v1154_v40, %v2375_v17  ;;  %v1237_v57 = vmul.f32 %v1154_v40, %v2371_v41 }
 0x2ff   :  { %v1397_v12 = vadd.f32 %v2884_v19, %v1236_v52  ;;  %v1398_v9 = vadd.f32 %v2884_v19, %v1237_v57  ;;  %v2899_v57 = vld [vmem:[#allocation23_spill] sm:$0xff] }
 0x300   :  { %v2721_v16 = vpop.permute.xlu2 %1208 }
 0x301   :  { %1443 = vst [vmem:[#allocation2 + $0xa0] sm:$0xff] %v1397_v12  ;;  %v2900_v12 = vld [vmem:[#allocation24_spill] sm:$0xff] }
 0x302   :  { %1444 = vst.msk [vmem:[#allocation2 + $0xa8] sm:$0xff] %vm343_vm0, %v1398_v9 }
 0x304   :  { %v1169_v10 = vpop.permute.xlu1 %1168 }
 0x305   :  { %v1242_v48 = vmul.f32 %v1169_v10, %v2397_v38  ;;  %v1243_v51 = vmul.f32 %v1169_v10, %v2386_v6  ;;  %v2901_v10 = vld [vmem:[#allocation36_spill] sm:$0xff] }
 0x307   :  { %v1403_v31 = vadd.f32 %v2885_v58, %v1242_v48  ;;  %v1404_v17 = vadd.f32 %v2885_v58, %v1243_v51  ;;  %v2902_v51 = vld [vmem:[#allocation35_spill] sm:$0xff] }
 0x308   :  { %v1134_v41 = vpop.permute.xlu2 %1133 }
 0x309   :  { %1449 = vst [vmem:[#allocation2 + $0xd0] sm:$0xff] %v1403_v31  ;;  %v1228_v20 = vmul.f32 %v1134_v41, %v2287_v53  ;;  %v1229_v5 = vmul.f32 %v1134_v41, %v2289_v55  ;;  %v2903_v31 = vld [vmem:[#allocation12_spill] sm:$0xff]  ;;  %v2904_v41 = vld [vmem:[#allocation9_spill] sm:$0xff] }
 0x30a   :  { %1450 = vst.msk [vmem:[#allocation2 + $0xd8] sm:$0xff] %vm343_vm0, %v1404_v17 }
 0x30b   :  { %v1389_v33 = vadd.f32 %v2886_v22, %v1228_v20  ;;  %v1390_v38 = vadd.f32 %v2886_v22, %v1229_v5 }
 0x30d   :  { %1435 = vst [vmem:[#allocation2 + $0x60] sm:$0xff] %v1389_v33  ;;  %v1184_v6 = vpop.permute.xlu1 %1183 }
 0x30e   :  { %1436 = vst.msk [vmem:[#allocation2 + $0x68] sm:$0xff] %vm343_vm0, %v1390_v38  ;;  %v1248_v61 = vmul.f32 %v1184_v6, %v2407_v30  ;;  %v1249_v54 = vmul.f32 %v1184_v6, %v2405_v36  ;;  %v2889_v30 = vld [vmem:[#allocation7_spill] sm:$0xff]  ;;  %v2905_v38 = vld [vmem:[#allocation30_spill] sm:$0xff] }
 0x30f   :  { %v1258_v6 = vmul.f32 %v2721_v16, %v2905_v38 }
 0x310   :  { %v1409_v49 = vadd.f32 %v2887_v2, %v1248_v61  ;;  %v1410_v53 = vadd.f32 %v2887_v2, %v1249_v54  ;;  %v1149_v47 = vpop.permute.xlu2 %1148  ;;  %v1119_v55 = vpop.permute.xlu0 %1118  ;;  %v2906_v61 = vld [vmem:[#allocation27_spill] sm:$0xff]  ;;  %v2907_v2 = vld [vmem:[#allocation28_spill] sm:$0xff] }
 0x311   :  { %v1234_v45 = vmul.f32 %v1149_v47, %v2448_v34  ;;  %v1235_v0 = vmul.f32 %v1149_v47, %v2444_v28  ;;  %v1222_v39 = vmul.f32 %v1119_v55, %v2213_v32  ;;  %v1223_v35 = vmul.f32 %v1119_v55, %v2888_v15  ;;  %v2892_v34 = vld [vmem:[#allocation25_spill] sm:$0xff] }
 0x312   :  { %1455 = vst [vmem:[#allocation2 + $0x100] sm:$0xff] %v1409_v49  ;;  %v1261_v50 = vmul.f32 %v1214_v3, %v2892_v34 }
 0x313   :  { %1456 = vst.msk [vmem:[#allocation2 + $0x108] sm:$0xff] %vm343_vm0, %v1410_v53  ;;  %v1395_v46 = vadd.f32 %v2889_v30, %v1234_v45  ;;  %v1396_v36 = vadd.f32 %v2889_v30, %v1235_v0  ;;  %v1383_v14 = vadd.f32 %v2890_v62, %v1222_v39  ;;  %v1384_v18 = vadd.f32 %v2890_v62, %v1223_v35  ;;  %v2908_v53 = vld [vmem:[#allocation29_spill] sm:$0xff]  ;;  %v2909_v45 = vld [vmem:[#allocation14_spill] sm:$0xff]  ;;  %v2911_v62 = vld [vmem:[#allocation32_spill] sm:$0xff] }
 0x314   :  { %v1259_v47 = vmul.f32 %v2721_v16, %v2908_v53 }
 0x315   :  { %1441 = vst [vmem:[#allocation2 + $0x90] sm:$0xff] %v1395_v46  ;;  %v2910_v46 = vld [vmem:[#allocation31_spill] sm:$0xff] }
 0x316   :  { %1442 = vst.msk [vmem:[#allocation2 + $0x98] sm:$0xff] %vm343_vm0, %v1396_v36  ;;  %v1375_v32 = vpop.permute.xlu1 %1374 }
 0x317   :  { %1429 = vst [vmem:[#allocation2 + $0x30] sm:$0xff] %v1383_v14  ;;  %v1421_v28 = vadd.f32 %v1375_v32, %v1260_v43  ;;  %v1422_v11 = vadd.f32 %v1375_v32, %v1261_v50  ;;  %v2913_v32 = vld [vmem:[#allocation18_spill] sm:$0xff] }
 0x318   :  { %1430 = vst.msk [vmem:[#allocation2 + $0x38] sm:$0xff] %vm343_vm0, %v1384_v18  ;;  %v1129_v59 = vpop.permute.xlu0 %1128  ;;  %v1164_v56 = vpop.permute.xlu2 %1163  ;;  %v2912_v18 = vld [vmem:[#allocation17_spill] sm:$0xff] }
 0x319   :  { %1467 = vst [vmem:[#allocation2 + $0x160] sm:$0xff] %v1421_v28  ;;  %v1226_v37 = vmul.f32 %v1129_v59, %v2893_v23  ;;  %v1227_v60 = vmul.f32 %v1129_v59, %v2894_v26  ;;  %v1240_v3 = vmul.f32 %v1164_v56, %v2895_v27  ;;  %v1241_v63 = vmul.f32 %v1164_v56, %v2896_v29  ;;  %v2914_v59 = vld [vmem:[#allocation20_spill] sm:$0xff]  ;;  %v2915_v23 = vld [vmem:[#allocation19_spill] sm:$0xff] }
 0x31a   :  { %1468 = vst.msk [vmem:[#allocation2 + $0x168] sm:$0xff] %vm343_vm0, %v1422_v11  ;;  %v1256_v56 = vmul.f32 %v2728_v24, %v2914_v59 }
 0x31b   :  { %v1387_v21 = vadd.f32 %v2897_v7, %v1226_v37  ;;  %v1401_v42 = vadd.f32 %v2898_v13, %v1240_v3  ;;  %v1402_v8 = vadd.f32 %v2898_v13, %v1241_v63  ;;  %v1388_v1 = vadd.f32 %v2897_v7, %v1227_v60 }
 0x31d   :  { %1433 = vst [vmem:[#allocation2 + $0x50] sm:$0xff] %v1387_v21 }
 0x31e   :  { %1447 = vst [vmem:[#allocation2 + $0xc0] sm:$0xff] %v1401_v42 }
 0x31f   :  { %1448 = vst.msk [vmem:[#allocation2 + $0xc8] sm:$0xff] %vm343_vm0, %v1402_v8 }
 0x320   :  { %1434 = vst.msk [vmem:[#allocation2 + $0x58] sm:$0xff] %vm343_vm0, %v1388_v1  ;;  %v1144_v40 = vpop.permute.xlu0 %1143  ;;  %v1179_v52 = vpop.permute.xlu2 %1178 }
 0x321   :  { %v1232_v19 = vmul.f32 %v1144_v40, %v2899_v57  ;;  %v1233_v9 = vmul.f32 %v1144_v40, %v2900_v12  ;;  %v1246_v48 = vmul.f32 %v1179_v52, %v2901_v10  ;;  %v1247_v58 = vmul.f32 %v1179_v52, %v2902_v51 }
 0x323   :  { %v1393_v17 = vadd.f32 %v2903_v31, %v1232_v19  ;;  %v1407_v20 = vadd.f32 %v2904_v41, %v1246_v48  ;;  %v1408_v5 = vadd.f32 %v2904_v41, %v1247_v58  ;;  %v1394_v22 = vadd.f32 %v2903_v31, %v1233_v9 }
 0x325   :  { %1439 = vst [vmem:[#allocation2 + $0x80] sm:$0xff] %v1393_v17 }
 0x326   :  { %1453 = vst [vmem:[#allocation2 + $0xf0] sm:$0xff] %v1407_v20 }
 0x327   :  { %1454 = vst.msk [vmem:[#allocation2 + $0xf8] sm:$0xff] %vm343_vm0, %v1408_v5 }
 0x328   :  { %1440 = vst.msk [vmem:[#allocation2 + $0x88] sm:$0xff] %vm343_vm0, %v1394_v22  ;;  %v1159_v33 = vpop.permute.xlu0 %1158 }
 0x329   :  { %v1238_v54 = vmul.f32 %v1159_v33, %v2906_v61  ;;  %v1239_v49 = vmul.f32 %v1159_v33, %v2907_v2  ;;  %v1370_v55 = vpop.permute.xlu2 %1369 }
 0x32a   :  { %v1419_v15 = vadd.f32 %v1370_v55, %v1258_v6  ;;  %v1420_v35 = vadd.f32 %v1370_v55, %v1259_v47 }
 0x32b   :  { %v1399_v0 = vadd.f32 %v2909_v45, %v1238_v54  ;;  %v1400_v39 = vadd.f32 %v2909_v45, %v1239_v49 }
 0x32c   :  { %1465 = vst [vmem:[#allocation2 + $0x150] sm:$0xff] %v1419_v15 }
 0x32d   :  { %1445 = vst [vmem:[#allocation2 + $0xb0] sm:$0xff] %v1399_v0 }
 0x32e   :  { %1446 = vst.msk [vmem:[#allocation2 + $0xb8] sm:$0xff] %vm343_vm0, %v1400_v39 }
 0x32f   :  { %1466 = vst.msk [vmem:[#allocation2 + $0x158] sm:$0xff] %vm343_vm0, %v1420_v35 }
 0x330   :  { %v1174_v30 = vpop.permute.xlu0 %1173 }
 0x331   :  { %v1244_v36 = vmul.f32 %v1174_v30, %v2910_v46  ;;  %v1245_v14 = vmul.f32 %v1174_v30, %v2911_v62 }
 0x333   :  { %v1405_v16 = vadd.f32 %v2912_v18, %v1244_v36  ;;  %v1406_v44 = vadd.f32 %v2912_v18, %v1245_v14 }
 0x335   :  { %1451 = vst [vmem:[#allocation2 + $0xe0] sm:$0xff] %v1405_v16 }
 0x336   :  { %1452 = vst.msk [vmem:[#allocation2 + $0xe8] sm:$0xff] %vm343_vm0, %v1406_v44 }
 0x360   :  { %v1189_v43 = vpop.permute.xlu0 %1188 }
 0x361   :  { %v1250_v34 = vmul.f32 %v1189_v43, %v2496_v25  ;;  %v1251_v50 = vmul.f32 %v1189_v43, %v2494_v4  ;;  %v1257_v25 = vmul.f32 %v2728_v24, %v2915_v23 }
 0x363   :  { %v1411_v28 = vadd.f32 %v2913_v32, %v1250_v34  ;;  %v1412_v11 = vadd.f32 %v2913_v32, %v1251_v50 }
 0x365   :  { %1457 = vst [vmem:[#allocation2 + $0x110] sm:$0xff] %v1411_v28 }
 0x366   :  { %1458 = vst.msk [vmem:[#allocation2 + $0x118] sm:$0xff] %vm343_vm0, %v1412_v11 }
 0x369   :  { %v1365_v4 = vpop.permute.xlu0 %1364 }
 0x36a   :  { %v1417_v37 = vadd.f32 %v1365_v4, %v1256_v56  ;;  %v1418_v26 = vadd.f32 %v1365_v4, %v1257_v25 }
 0x36c   :  { %1463 = vst [vmem:[#allocation2 + $0x140] sm:$0xff] %v1417_v37 }
 0x36d   :  { %1464 = vst.msk [vmem:[#allocation2 + $0x148] sm:$0xff] %vm343_vm0, %v1418_v26 }
 0x36e   :  { %1481 = dma.vmem_to_hbm [thread:$0]  %s1474_s21, 5888, %s1476_s24, [#allocation3], %s1689_s25, %s1689_s25, %s1690_s26  }
 0x36f   :  { %1684 = dma.done.wait [#allocation3], 5888  }
 0x370   :  { %1685 = vsyncadd [#allocation3], 4294961408 }
 0x371   :  { %1486 = vsyncpa [#allocation3], 1 }

</bundles_post_ra>
